<compile_context>
chip_gen: v7x
topology: tpu7x:2x2x1
jax: 0.10.0
libtpu: 0.0.40
codegen_flags: <defaults>
</compile_context>

<pallas_src>
import functools

import jax
import jax.numpy as jnp
from jax.experimental import pallas as pl
from jax.experimental.pallas import tpu as pltpu


# ---------------------------------------------------------------------------
# small shape helpers (host-side, static)
# ---------------------------------------------------------------------------
def _round_up(n, m):
    return ((n + m - 1) // m) * m


def _pick_tile(n, cap, step):
    """Largest multiple of `step`, <= cap, that divides n (n is a multiple of step)."""
    t = min(cap, n)
    t -= t % step
    while t > step and n % t != 0:
        t -= step
    return max(t, step)


def _pad2(a, rows, cols):
    return jnp.pad(a, ((0, rows - a.shape[0]), (0, cols - a.shape[1])))


def _pad_gates_cols(w, rows_pad, H, Hp):
    """w: (rows, 3H) with gate blocks [r|z|n] -> (rows_pad, 3*Hp), each gate padded."""
    return jnp.concatenate(
        [_pad2(w[:, g * H:(g + 1) * H], rows_pad, Hp) for g in range(3)], axis=1)


def _pad_gates_bias(b, H, Hp):
    """b: (3H,) gate order [r|z|n] -> (1, 3*Hp)."""
    return jnp.concatenate(
        [jnp.pad(b[g * H:(g + 1) * H], (0, Hp - H)) for g in range(3)])[None, :]


# ---------------------------------------------------------------------------
# Tiled matmul + bias kernel:  C(M,N) = A(M,K) @ W(K,N) + b(1,N)
# Used for the hoisted GRU input projections, the context projection and the
# dense (logits) head.  K is kept resident; grid tiles M and N, both parallel.
# ---------------------------------------------------------------------------
def _matmul_bias_kernel(a_ref, w_ref, b_ref, o_ref):
    acc = jnp.dot(a_ref[...], w_ref[...], preferred_element_type=jnp.float32)
    o_ref[...] = (acc + b_ref[...].astype(jnp.float32)).astype(o_ref.dtype)


def matmul_bias(a, w, b, out_dtype, *, tile_m_cap=256, tile_n_cap=512):
    """a:(M,K), w:(K,N), b:(1,N).  M % 8 == 0, K % 128 == 0, N % 128 == 0."""
    M, K = a.shape
    N = w.shape[1]
    tm = _pick_tile(M, tile_m_cap, 8)
    tn = _pick_tile(N, tile_n_cap, 128)   # halve caps when re-tuning for v7x's 64 MiB VMEM
    return pl.pallas_call(
        _matmul_bias_kernel,
        out_shape=jax.ShapeDtypeStruct((M, N), out_dtype),
        grid=(M // tm, N // tn),
        in_specs=[
            pl.BlockSpec((tm, K), lambda i, j: (i, 0)),
            pl.BlockSpec((K, tn), lambda i, j: (0, j)),
            pl.BlockSpec((1, tn), lambda i, j: (0, j)),
        ],
        out_specs=pl.BlockSpec((tm, tn), lambda i, j: (i, j)),
        compiler_params=pltpu.CompilerParams(
            dimension_semantics=("parallel", "parallel")),
    )(a, w, b)


# ---------------------------------------------------------------------------
# GRU recurrence kernel (one layer).  The input projection X_proj (incl. input
# biases) is precomputed; the per-step work is a single (B,H)x(H,3H) matmul.
# torch.nn.GRU equations, gate order (r, z, n):
#   r = sigmoid(xp_r + hp_r)
#   z = sigmoid(xp_z + hp_z)
#   n = tanh  (xp_n + r * (hp_n + b_hn))
#   h' = (1 - z) * n + z * h  ==  n + z * (h - n)
# ---------------------------------------------------------------------------
def _gru_layer_kernel(xproj_ref, sbias_ref, whh_ref, bhn_ref, h0_ref,
                      y_ref, hf_ref, h_sc):
    i = pl.program_id(0)

    @pl.when(i == 0)
    def _():
        h_sc[...] = h0_ref[...].astype(jnp.float32)

    H = h0_ref.shape[-1]
    tc = y_ref.shape[0]
    whh = whh_ref[...]                                  # (H, 3H) bf16, resident
    sbias = sbias_ref[...].astype(jnp.float32)          # (B, 3H) per-step additive term
    bhn = bhn_ref[...].astype(jnp.float32)              # (1, H)

    def step(t, h):
        xp = xproj_ref[pl.ds(t, 1)][0].astype(jnp.float32) + sbias      # (B, 3H)
        hp = jnp.dot(h.astype(jnp.bfloat16), whh,
                     preferred_element_type=jnp.float32)                # (B, 3H)
        r = jax.nn.sigmoid(xp[:, :H] + hp[:, :H])
        z = jax.nn.sigmoid(xp[:, H:2 * H] + hp[:, H:2 * H])
        n = jnp.tanh(xp[:, 2 * H:] + r * (hp[:, 2 * H:] + bhn))
        h_new = n + z * (h - n)
        y_ref[pl.ds(t, 1)] = h_new[None].astype(y_ref.dtype)
        return h_new

    h_last = jax.lax.fori_loop(0, tc, step, h_sc[...], unroll=True)
    h_sc[...] = h_last

    @pl.when(i == pl.num_programs(0) - 1)
    def _():
        hf_ref[...] = h_last.astype(hf_ref.dtype)


def gru_layer(xproj, sbias, whh, bhn, h0, *, time_chunk_cap=16):
    """xproj:(T,B,3H) bf16, sbias:(B,3H) f32, whh:(H,3H) bf16, bhn:(1,H) f32,
    h0:(B,H) f32.  Returns y:(T,B,H) bf16 and final hidden (B,H) f32."""
    T, B, H3 = xproj.shape
    H = h0.shape[-1]
    tc = _pick_tile(T, time_chunk_cap, 1)
    return pl.pallas_call(
        _gru_layer_kernel,
        out_shape=(jax.ShapeDtypeStruct((T, B, H), jnp.bfloat16),
                   jax.ShapeDtypeStruct((B, H), jnp.float32)),
        grid=(T // tc,),
        in_specs=[
            pl.BlockSpec((tc, B, H3), lambda i: (i, 0, 0)),
            pl.BlockSpec((B, H3), lambda i: (0, 0)),
            pl.BlockSpec((H, H3), lambda i: (0, 0)),
            pl.BlockSpec((1, H), lambda i: (0, 0)),
            pl.BlockSpec((B, H), lambda i: (0, 0)),
        ],
        out_specs=(
            pl.BlockSpec((tc, B, H), lambda i: (i, 0, 0)),
            pl.BlockSpec((B, H), lambda i: (0, 0)),
        ),
        scratch_shapes=[pltpu.VMEM((B, H), jnp.float32)],
        compiler_params=pltpu.CompilerParams(dimension_semantics=("arbitrary",)),
    )(xproj, sbias, whh, bhn, h0)


# ---------------------------------------------------------------------------
# Parameter construction (mirrors the PyTorch module; fused gate layout r|z|n)
# ---------------------------------------------------------------------------
def xavier_uniform(key, shape, fan_in, fan_out):
    limit = jnp.sqrt(6.0 / (fan_in + fan_out))
    return jax.random.uniform(key, shape, jnp.float32, -limit, limit)


def init_params(key, vocab_size, embed_size, num_hiddens, num_layers):
    keys = jax.random.split(key, 3 + num_layers)
    params = {"embedding": jax.random.normal(keys[0], (vocab_size, embed_size),
                                             jnp.float32)}
    layers = []
    bound = 1.0 / jnp.sqrt(num_hiddens)
    for l in range(num_layers):
        d_in = embed_size + num_hiddens if l == 0 else num_hiddens
        k = jax.random.split(keys[1 + l], 4)
        layers.append(dict(
            w_ih=xavier_uniform(k[0], (d_in, 3 * num_hiddens), d_in, 3 * num_hiddens),
            w_hh=xavier_uniform(k[1], (num_hiddens, 3 * num_hiddens),
                                num_hiddens, 3 * num_hiddens),
            b_ih=jax.random.uniform(k[2], (3 * num_hiddens,), jnp.float32,
                                    -bound, bound),
            b_hh=jax.random.uniform(k[3], (3 * num_hiddens,), jnp.float32,
                                    -bound, bound),
        ))
    params["gru"] = layers
    params["dense_w"] = xavier_uniform(keys[-2], (num_hiddens, vocab_size),
                                       num_hiddens, vocab_size)
    params["dense_b"] = jax.random.uniform(keys[-1], (vocab_size,), jnp.float32,
                                           -bound, bound)
    return params


# ---------------------------------------------------------------------------
# Seq2SeqDecoder forward
# ---------------------------------------------------------------------------
def seq2seq_decoder_forward(params, x, state):
    """x: (B, T) int tokens; state = (enc_output (T_enc,B,H), hidden (L,B,H))."""
    enc_output, hidden_state = state
    B, T = x.shape
    E = params["embedding"].shape[1]
    H = hidden_state.shape[-1]
    V = params["dense_w"].shape[1]
    f32, bf16 = jnp.float32, jnp.bfloat16

    Bp = _round_up(max(B, 8), 8)
    Hp = _round_up(H, 128)
    Ep = _round_up(E, 128)
    Vp = _round_up(V, 128)
    H3p = 3 * Hp

    # glue (plain JAX): embedding gather, zero padding, layout
    embs = jnp.take(params["embedding"], x.T.astype(jnp.int32), axis=0)   # (T,B,E)
    embs = jnp.pad(embs, ((0, 0), (0, Bp - B), (0, Ep - E))).astype(bf16)
    context = _pad2(enc_output[-1].astype(f32), Bp, Hp).astype(bf16)      # (Bp,Hp)
    h0_all = jnp.pad(hidden_state.astype(f32),
                     ((0, 0), (0, Bp - B), (0, Hp - H)))                  # (L,Bp,Hp)

    zeros_sbias = jnp.zeros((Bp, H3p), f32)
    zeros_bias3 = jnp.zeros((1, H3p), f32)

    layer_x = embs.reshape(T * Bp, Ep)                                    # bf16
    new_hidden = []
    y = None
    for l, p in enumerate(params["gru"]):
        w_ih = p["w_ih"].astype(f32)
        w_hh = p["w_hh"].astype(f32)
        b_ih = p["b_ih"].astype(f32)
        b_hh = p["b_hh"].astype(f32)

        if l == 0:
            # layer-0 torch input is cat(emb, context): split W_ih rows accordingly
            w_x = _pad_gates_cols(w_ih[:E], Ep, H, Hp).astype(bf16)       # (Ep,3Hp)
            w_c = _pad_gates_cols(w_ih[E:], Hp, H, Hp).astype(bf16)       # (Hp,3Hp)
            # context projection computed ONCE (constant over time)
            sbias = matmul_bias(context, w_c, zeros_bias3, f32)           # (Bp,3Hp)
        else:
            w_x = _pad_gates_cols(w_ih, Hp, H, Hp).astype(bf16)           # (Hp,3Hp)
            sbias = zeros_sbias

        # fold b_ir+b_hr, b_iz+b_hz, b_in into the hoisted projection bias;
        # b_hn stays inside the recurrence (multiplied by r).
        b_fold = b_ih + jnp.concatenate([b_hh[:2 * H], jnp.zeros((H,), f32)])
        b_fold = _pad_gates_bias(b_fold, H, Hp)                           # (1,3Hp)
        b_hn = jnp.pad(b_hh[2 * H:], (0, Hp - H))[None, :]                # (1,Hp)
        whh = _pad_gates_cols(w_hh, Hp, H, Hp).astype(bf16)               # (Hp,3Hp)

        # hoisted input-side projection: one big (T*Bp, D) @ (D, 3Hp) matmul
        xproj = matmul_bias(layer_x, w_x, b_fold, bf16)                   # (T*Bp,3Hp)

        y, hf = gru_layer(xproj.reshape(T, Bp, H3p), sbias, whh, b_hn, h0_all[l])
        new_hidden.append(hf)
        layer_x = y.reshape(T * Bp, Hp)   # dropout=0 / eval: no inter-layer dropout

    # dense head; B/T swap done on the H-wide tensor before the matmul
    yt = jnp.swapaxes(y, 0, 1).reshape(Bp * T, Hp)                        # bf16
    wd = _pad2(params["dense_w"].astype(f32), Hp, Vp).astype(bf16)
    bd = jnp.pad(params["dense_b"].astype(f32), (0, Vp - V))[None, :]
    logits = matmul_bias(yt, wd, bd, f32)                                 # (Bp*T,Vp)
    logits = logits.reshape(Bp, T, Vp)[:B, :, :V]                         # (B,T,V)

    new_hidden = jnp.stack(new_hidden, axis=0)[:, :B, :H]                 # (L,B,H)
    return logits, [enc_output, new_hidden]


# ---------------------------------------------------------------------------
# Pure-JAX reference mirroring the kernel's mixed precision
# (bf16 matmul operands, f32 accumulation / f32 carried state)
# ---------------------------------------------------------------------------
def reference_forward(params, x, state):
    f32, bf16 = jnp.float32, jnp.bfloat16
    enc_output, hidden_state = state
    B, T = x.shape
    E = params["embedding"].shape[1]
    H = hidden_state.shape[-1]

    embs = jnp.take(params["embedding"], x.T.astype(jnp.int32), axis=0).astype(bf16)
    context = enc_output[-1].astype(bf16)                                 # (B,H)

    layer_in = embs                                                       # (T,B,E)
    new_hidden = []
    for l, p in enumerate(params["gru"]):
        w_ih = p["w_ih"].astype(f32)
        w_hh = p["w_hh"].astype(f32)
        b_ih = p["b_ih"].astype(f32)
        b_hh = p["b_hh"].astype(f32)
        if l == 0:
            w_x, w_c = w_ih[:E], w_ih[E:]
        else:
            w_x, w_c = w_ih, None
        b_fold = b_ih + jnp.concatenate([b_hh[:2 * H], jnp.zeros((H,), f32)])
        b_hn = b_hh[2 * H:]

        D = layer_in.shape[-1]
        xproj = (jnp.dot(layer_in.reshape(T * B, D), w_x.astype(bf16),
                         preferred_element_type=f32).reshape(T, B, 3 * H)
                 + b_fold).astype(bf16)
        if l == 0:
            sbias = jnp.dot(context, w_c.astype(bf16), preferred_element_type=f32)
        else:
            sbias = jnp.zeros((B, 3 * H), f32)
        whh_b = w_hh.astype(bf16)

        def step(h, xp_t, whh_b=whh_b, sbias=sbias, b_hn=b_hn):
            xp = xp_t.astype(f32) + sbias
            hp = jnp.dot(h.astype(bf16), whh_b, preferred_element_type=f32)
            r = jax.nn.sigmoid(xp[:, :H] + hp[:, :H])
            z = jax.nn.sigmoid(xp[:, H:2 * H] + hp[:, H:2 * H])
            n = jnp.tanh(xp[:, 2 * H:] + r * (hp[:, 2 * H:] + b_hn))
            h_new = n + z * (h - n)
            return h_new, h_new.astype(bf16)

        hf, ys = jax.lax.scan(step, hidden_state[l].astype(f32), xproj)
        new_hidden.append(hf)
        layer_in = ys                                                     # (T,B,H)

    yt = jnp.swapaxes(layer_in, 0, 1).reshape(B * T, H)
    logits = (jnp.dot(yt, params["dense_w"].astype(bf16),
                      preferred_element_type=f32)
              + params["dense_b"].astype(f32)).reshape(B, T, -1)
    return logits, jnp.stack(new_hidden, axis=0)


if __name__ == "__main__":
    vocab_size, embed_size, num_hiddens, num_layers = 64, 32, 32, 2
    B, T, T_enc = 2, 8, 8

    key = jax.random.PRNGKey(0)
    k_par, k_x, k_enc, k_hid = jax.random.split(key, 4)
    params = init_params(k_par, vocab_size, embed_size, num_hiddens, num_layers)

    x = jax.random.randint(k_x, (B, T), 0, vocab_size, jnp.int32)
    enc_output = jax.random.normal(k_enc, (T_enc, B, num_hiddens), jnp.float32)
    hidden_state = jax.random.normal(k_hid, (num_layers, B, num_hiddens), jnp.float32)
    state = (enc_output, hidden_state)

    fwd = jax.jit(functools.partial(seq2seq_decoder_forward, params))
    logits, (enc_out_ret, new_hidden) = fwd(x, state)
    jax.block_until_ready(logits)
    jax.block_until_ready(new_hidden)

    ref_logits, ref_hidden = reference_forward(params, x, state)
    assert logits.shape == (B, T, vocab_size)
    assert new_hidden.shape == (num_layers, B, num_hiddens)
    assert jnp.allclose(logits, ref_logits, atol=2e-2, rtol=2e-2), (
        float(jnp.max(jnp.abs(logits - ref_logits))))
    assert jnp.allclose(new_hidden, ref_hidden, atol=2e-2, rtol=2e-2), (
        float(jnp.max(jnp.abs(new_hidden - ref_hidden))))

    print("KERNEL_OK")
</pallas_src>

<mosaic_0001>
module attributes {stable_mosaic.version = 11 : i64} {
  func.func @_gru_layer_kernel(%arg0: i32, %arg1: memref<8x8x384xbf16, #tpu.memory_space<vmem>>, %arg2: memref<8x384xf32, #tpu.memory_space<vmem>>, %arg3: memref<128x384xbf16, #tpu.memory_space<vmem>>, %arg4: memref<1x128xf32, #tpu.memory_space<vmem>>, %arg5: memref<8x128xf32, #tpu.memory_space<vmem>>, %arg6: memref<8x8x128xbf16, #tpu.memory_space<vmem>>, %arg7: memref<8x128xf32, #tpu.memory_space<vmem>>, %arg8: memref<8x128xf32, #tpu.memory_space<vmem>>) attributes {dimension_semantics = [#tpu.dimension_semantics<arbitrary>], iteration_bounds = array<i64: 1>, scalar_prefetch = 0 : i64, scratch_operands = 1 : i64, tpu.core_type = #tpu.core_type<tc>, window_params = [{transform_indices = @transform_0, window_bounds = array<i64: 8, 8, 384>}, {pipeline_mode = #tpu.pipeline_mode<synchronous>, transform_indices = @transform_1, window_bounds = array<i64: 8, 384>}, {pipeline_mode = #tpu.pipeline_mode<synchronous>, transform_indices = @transform_2, window_bounds = array<i64: 128, 384>}, {pipeline_mode = #tpu.pipeline_mode<synchronous>, transform_indices = @transform_3, window_bounds = array<i64: 1, 128>}, {pipeline_mode = #tpu.pipeline_mode<synchronous>, transform_indices = @transform_4, window_bounds = array<i64: 8, 128>}, {transform_indices = @transform_5, window_bounds = array<i64: 8, 8, 128>}, {pipeline_mode = #tpu.pipeline_mode<synchronous>, transform_indices = @transform_6, window_bounds = array<i64: 8, 128>}]} {
    %c0_i32 = arith.constant 0 : i32
    %0 = arith.cmpi eq, %arg0, %c0_i32 : i32
    %1 = arith.extui %0 : i1 to i32
    %c0_i32_0 = arith.constant 0 : i32
    %2 = arith.cmpi ne, %1, %c0_i32_0 : i32
    scf.if %2 {
      %c0_68 = arith.constant 0 : index
      %c0_69 = arith.constant 0 : index
      %307 = vector.load %arg5[%c0_68, %c0_69] : memref<8x128xf32, #tpu.memory_space<vmem>>, vector<8x128xf32>
      %c0_70 = arith.constant 0 : index
      %c0_71 = arith.constant 0 : index
      %308 = vector.load %arg8[%c0_70, %c0_71] : memref<8x128xf32, #tpu.memory_space<vmem>>, vector<8x128xf32>
      tpu.vector_store %arg8[%c0_70, %c0_71], %307 {strides = array<i32>} : memref<8x128xf32, #tpu.memory_space<vmem>>, vector<8x128xf32>,
    } else {
    }
    %c0 = arith.constant 0 : index
    %c0_1 = arith.constant 0 : index
    %3 = vector.load %arg3[%c0, %c0_1] : memref<128x384xbf16, #tpu.memory_space<vmem>>, vector<128x384xbf16>
    %c0_2 = arith.constant 0 : index
    %c0_3 = arith.constant 0 : index
    %4 = vector.load %arg2[%c0_2, %c0_3] : memref<8x384xf32, #tpu.memory_space<vmem>>, vector<8x384xf32>
    %c0_4 = arith.constant 0 : index
    %c0_5 = arith.constant 0 : index
    %5 = vector.load %arg4[%c0_4, %c0_5] : memref<1x128xf32, #tpu.memory_space<vmem>>, vector<1x128xf32>
    %c0_6 = arith.constant 0 : index
    %c0_7 = arith.constant 0 : index
    %6 = vector.load %arg8[%c0_6, %c0_7] : memref<8x128xf32, #tpu.memory_space<vmem>>, vector<8x128xf32>
    %c0_i32_8 = arith.constant 0 : i32
    %7 = arith.index_cast %c0_i32_8 : i32 to index
    %c0_9 = arith.constant 0 : index
    %c0_10 = arith.constant 0 : index
    %8 = vector.load %arg1[%7, %c0_9, %c0_10] : memref<8x8x384xbf16, #tpu.memory_space<vmem>>, vector<1x8x384xbf16>
    %9 = vector.shape_cast %8 : vector<1x8x384xbf16> to vector<8x384xbf16>
    %10 = arith.extf %9 : vector<8x384xbf16> to vector<8x384xf32>
    %11 = arith.addf %10, %4 : vector<8x384xf32>
    %12 = arith.truncf %6 : vector<8x128xf32> to vector<8x128xbf16>
    %cst = arith.constant dense<0.000000e+00> : vector<8x384xf32>
    %13 = tpu.matmul %12, %3, %cst {dimension_numbers = #tpu.dot_dimension_numbers<[1], [0], [0], [1], [0, 0, 1, 1], [], []>} : vector<8x128xbf16>, vector<128x384xbf16>, vector<8x384xf32> -> vector<8x384xf32>
    %14 = vector.extract_strided_slice %11 {offsets = [0, 0], sizes = [8, 128], strides = [1, 1]} : vector<8x384xf32> to vector<8x128xf32>
    %15 = vector.extract_strided_slice %13 {offsets = [0, 0], sizes = [8, 128], strides = [1, 1]} : vector<8x384xf32> to vector<8x128xf32>
    %16 = arith.addf %14, %15 : vector<8x128xf32>
    %17 = arith.negf %16 : vector<8x128xf32>
    %18 = math.exp %17 : vector<8x128xf32>
    %cst_11 = arith.constant 1.000000e+00 : f32
    %19 = vector.broadcast %cst_11 : f32 to vector<8x128xf32>
    %20 = arith.addf %19, %18 : vector<8x128xf32>
    %21 = arith.divf %19, %20 : vector<8x128xf32>
    %22 = vector.extract_strided_slice %11 {offsets = [0, 128], sizes = [8, 128], strides = [1, 1]} : vector<8x384xf32> to vector<8x128xf32>
    %23 = vector.extract_strided_slice %13 {offsets = [0, 128], sizes = [8, 128], strides = [1, 1]} : vector<8x384xf32> to vector<8x128xf32>
    %24 = arith.addf %22, %23 : vector<8x128xf32>
    %25 = arith.negf %24 : vector<8x128xf32>
    %26 = math.exp %25 : vector<8x128xf32>
    %cst_12 = arith.constant 1.000000e+00 : f32
    %27 = vector.broadcast %cst_12 : f32 to vector<8x128xf32>
    %28 = arith.addf %27, %26 : vector<8x128xf32>
    %29 = arith.divf %27, %28 : vector<8x128xf32>
    %30 = vector.extract_strided_slice %11 {offsets = [0, 256], sizes = [8, 128], strides = [1, 1]} : vector<8x384xf32> to vector<8x128xf32>
    %31 = vector.extract_strided_slice %13 {offsets = [0, 256], sizes = [8, 128], strides = [1, 1]} : vector<8x384xf32> to vector<8x128xf32>
    %32 = vector.broadcast %5 : vector<1x128xf32> to vector<8x128xf32>
    %33 = arith.addf %31, %32 : vector<8x128xf32>
    %34 = arith.mulf %21, %33 : vector<8x128xf32>
    %35 = arith.addf %30, %34 : vector<8x128xf32>
    %36 = math.tanh %35 : vector<8x128xf32>
    %37 = arith.subf %6, %36 : vector<8x128xf32>
    %38 = arith.mulf %29, %37 : vector<8x128xf32>
    %39 = arith.addf %36, %38 : vector<8x128xf32>
    %40 = vector.shape_cast %39 : vector<8x128xf32> to vector<1x8x128xf32>
    %41 = arith.truncf %40 : vector<1x8x128xf32> to vector<1x8x128xbf16>
    %42 = arith.index_cast %c0_i32_8 : i32 to index
    %c0_13 = arith.constant 0 : index
    %c0_14 = arith.constant 0 : index
    %43 = vector.load %arg6[%42, %c0_13, %c0_14] : memref<8x8x128xbf16, #tpu.memory_space<vmem>>, vector<1x8x128xbf16>
    tpu.vector_store %arg6[%42, %c0_13, %c0_14], %41 {strides = array<i32>} : memref<8x8x128xbf16, #tpu.memory_space<vmem>>, vector<1x8x128xbf16>,
    %c1_i32 = arith.constant 1 : i32
    %44 = arith.index_cast %c1_i32 : i32 to index
    %c0_15 = arith.constant 0 : index
    %c0_16 = arith.constant 0 : index
    %45 = vector.load %arg1[%44, %c0_15, %c0_16] : memref<8x8x384xbf16, #tpu.memory_space<vmem>>, vector<1x8x384xbf16>
    %46 = vector.shape_cast %45 : vector<1x8x384xbf16> to vector<8x384xbf16>
    %47 = arith.extf %46 : vector<8x384xbf16> to vector<8x384xf32>
    %48 = arith.addf %47, %4 : vector<8x384xf32>
    %49 = arith.truncf %39 : vector<8x128xf32> to vector<8x128xbf16>
    %cst_17 = arith.constant dense<0.000000e+00> : vector<8x384xf32>
    %50 = tpu.matmul %49, %3, %cst_17 {dimension_numbers = #tpu.dot_dimension_numbers<[1], [0], [0], [1], [0, 0, 1, 1], [], []>} : vector<8x128xbf16>, vector<128x384xbf16>, vector<8x384xf32> -> vector<8x384xf32>
    %51 = vector.extract_strided_slice %48 {offsets = [0, 0], sizes = [8, 128], strides = [1, 1]} : vector<8x384xf32> to vector<8x128xf32>
    %52 = vector.extract_strided_slice %50 {offsets = [0, 0], sizes = [8, 128], strides = [1, 1]} : vector<8x384xf32> to vector<8x128xf32>
    %53 = arith.addf %51, %52 : vector<8x128xf32>
    %54 = arith.negf %53 : vector<8x128xf32>
    %55 = math.exp %54 : vector<8x128xf32>
    %cst_18 = arith.constant 1.000000e+00 : f32
    %56 = vector.broadcast %cst_18 : f32 to vector<8x128xf32>
    %57 = arith.addf %56, %55 : vector<8x128xf32>
    %58 = arith.divf %56, %57 : vector<8x128xf32>
    %59 = vector.extract_strided_slice %48 {offsets = [0, 128], sizes = [8, 128], strides = [1, 1]} : vector<8x384xf32> to vector<8x128xf32>
    %60 = vector.extract_strided_slice %50 {offsets = [0, 128], sizes = [8, 128], strides = [1, 1]} : vector<8x384xf32> to vector<8x128xf32>
    %61 = arith.addf %59, %60 : vector<8x128xf32>
    %62 = arith.negf %61 : vector<8x128xf32>
    %63 = math.exp %62 : vector<8x128xf32>
    %cst_19 = arith.constant 1.000000e+00 : f32
    %64 = vector.broadcast %cst_19 : f32 to vector<8x128xf32>
    %65 = arith.addf %64, %63 : vector<8x128xf32>
    %66 = arith.divf %64, %65 : vector<8x128xf32>
    %67 = vector.extract_strided_slice %48 {offsets = [0, 256], sizes = [8, 128], strides = [1, 1]} : vector<8x384xf32> to vector<8x128xf32>
    %68 = vector.extract_strided_slice %50 {offsets = [0, 256], sizes = [8, 128], strides = [1, 1]} : vector<8x384xf32> to vector<8x128xf32>
    %69 = vector.broadcast %5 : vector<1x128xf32> to vector<8x128xf32>
    %70 = arith.addf %68, %69 : vector<8x128xf32>
    %71 = arith.mulf %58, %70 : vector<8x128xf32>
    %72 = arith.addf %67, %71 : vector<8x128xf32>
    %73 = math.tanh %72 : vector<8x128xf32>
    %74 = arith.subf %39, %73 : vector<8x128xf32>
    %75 = arith.mulf %66, %74 : vector<8x128xf32>
    %76 = arith.addf %73, %75 : vector<8x128xf32>
    %77 = vector.shape_cast %76 : vector<8x128xf32> to vector<1x8x128xf32>
    %78 = arith.truncf %77 : vector<1x8x128xf32> to vector<1x8x128xbf16>
    %79 = arith.index_cast %c1_i32 : i32 to index
    %c0_20 = arith.constant 0 : index
    %c0_21 = arith.constant 0 : index
    %80 = vector.load %arg6[%79, %c0_20, %c0_21] : memref<8x8x128xbf16, #tpu.memory_space<vmem>>, vector<1x8x128xbf16>
    tpu.vector_store %arg6[%79, %c0_20, %c0_21], %78 {strides = array<i32>} : memref<8x8x128xbf16, #tpu.memory_space<vmem>>, vector<1x8x128xbf16>,
    %c2_i32 = arith.constant 2 : i32
    %81 = arith.index_cast %c2_i32 : i32 to index
    %c0_22 = arith.constant 0 : index
    %c0_23 = arith.constant 0 : index
    %82 = vector.load %arg1[%81, %c0_22, %c0_23] : memref<8x8x384xbf16, #tpu.memory_space<vmem>>, vector<1x8x384xbf16>
    %83 = vector.shape_cast %82 : vector<1x8x384xbf16> to vector<8x384xbf16>
    %84 = arith.extf %83 : vector<8x384xbf16> to vector<8x384xf32>
    %85 = arith.addf %84, %4 : vector<8x384xf32>
    %86 = arith.truncf %76 : vector<8x128xf32> to vector<8x128xbf16>
    %cst_24 = arith.constant dense<0.000000e+00> : vector<8x384xf32>
    %87 = tpu.matmul %86, %3, %cst_24 {dimension_numbers = #tpu.dot_dimension_numbers<[1], [0], [0], [1], [0, 0, 1, 1], [], []>} : vector<8x128xbf16>, vector<128x384xbf16>, vector<8x384xf32> -> vector<8x384xf32>
    %88 = vector.extract_strided_slice %85 {offsets = [0, 0], sizes = [8, 128], strides = [1, 1]} : vector<8x384xf32> to vector<8x128xf32>
    %89 = vector.extract_strided_slice %87 {offsets = [0, 0], sizes = [8, 128], strides = [1, 1]} : vector<8x384xf32> to vector<8x128xf32>
    %90 = arith.addf %88, %89 : vector<8x128xf32>
    %91 = arith.negf %90 : vector<8x128xf32>
    %92 = math.exp %91 : vector<8x128xf32>
    %cst_25 = arith.constant 1.000000e+00 : f32
    %93 = vector.broadcast %cst_25 : f32 to vector<8x128xf32>
    %94 = arith.addf %93, %92 : vector<8x128xf32>
    %95 = arith.divf %93, %94 : vector<8x128xf32>
    %96 = vector.extract_strided_slice %85 {offsets = [0, 128], sizes = [8, 128], strides = [1, 1]} : vector<8x384xf32> to vector<8x128xf32>
    %97 = vector.extract_strided_slice %87 {offsets = [0, 128], sizes = [8, 128], strides = [1, 1]} : vector<8x384xf32> to vector<8x128xf32>
    %98 = arith.addf %96, %97 : vector<8x128xf32>
    %99 = arith.negf %98 : vector<8x128xf32>
    %100 = math.exp %99 : vector<8x128xf32>
    %cst_26 = arith.constant 1.000000e+00 : f32
    %101 = vector.broadcast %cst_26 : f32 to vector<8x128xf32>
    %102 = arith.addf %101, %100 : vector<8x128xf32>
    %103 = arith.divf %101, %102 : vector<8x128xf32>
    %104 = vector.extract_strided_slice %85 {offsets = [0, 256], sizes = [8, 128], strides = [1, 1]} : vector<8x384xf32> to vector<8x128xf32>
    %105 = vector.extract_strided_slice %87 {offsets = [0, 256], sizes = [8, 128], strides = [1, 1]} : vector<8x384xf32> to vector<8x128xf32>
    %106 = vector.broadcast %5 : vector<1x128xf32> to vector<8x128xf32>
    %107 = arith.addf %105, %106 : vector<8x128xf32>
    %108 = arith.mulf %95, %107 : vector<8x128xf32>
    %109 = arith.addf %104, %108 : vector<8x128xf32>
    %110 = math.tanh %109 : vector<8x128xf32>
    %111 = arith.subf %76, %110 : vector<8x128xf32>
    %112 = arith.mulf %103, %111 : vector<8x128xf32>
    %113 = arith.addf %110, %112 : vector<8x128xf32>
    %114 = vector.shape_cast %113 : vector<8x128xf32> to vector<1x8x128xf32>
    %115 = arith.truncf %114 : vector<1x8x128xf32> to vector<1x8x128xbf16>
    %116 = arith.index_cast %c2_i32 : i32 to index
    %c0_27 = arith.constant 0 : index
    %c0_28 = arith.constant 0 : index
    %117 = vector.load %arg6[%116, %c0_27, %c0_28] : memref<8x8x128xbf16, #tpu.memory_space<vmem>>, vector<1x8x128xbf16>
    tpu.vector_store %arg6[%116, %c0_27, %c0_28], %115 {strides = array<i32>} : memref<8x8x128xbf16, #tpu.memory_space<vmem>>, vector<1x8x128xbf16>,
    %c3_i32 = arith.constant 3 : i32
    %118 = arith.index_cast %c3_i32 : i32 to index
    %c0_29 = arith.constant 0 : index
    %c0_30 = arith.constant 0 : index
    %119 = vector.load %arg1[%118, %c0_29, %c0_30] : memref<8x8x384xbf16, #tpu.memory_space<vmem>>, vector<1x8x384xbf16>
    %120 = vector.shape_cast %119 : vector<1x8x384xbf16> to vector<8x384xbf16>
    %121 = arith.extf %120 : vector<8x384xbf16> to vector<8x384xf32>
    %122 = arith.addf %121, %4 : vector<8x384xf32>
    %123 = arith.truncf %113 : vector<8x128xf32> to vector<8x128xbf16>
    %cst_31 = arith.constant dense<0.000000e+00> : vector<8x384xf32>
    %124 = tpu.matmul %123, %3, %cst_31 {dimension_numbers = #tpu.dot_dimension_numbers<[1], [0], [0], [1], [0, 0, 1, 1], [], []>} : vector<8x128xbf16>, vector<128x384xbf16>, vector<8x384xf32> -> vector<8x384xf32>
    %125 = vector.extract_strided_slice %122 {offsets = [0, 0], sizes = [8, 128], strides = [1, 1]} : vector<8x384xf32> to vector<8x128xf32>
    %126 = vector.extract_strided_slice %124 {offsets = [0, 0], sizes = [8, 128], strides = [1, 1]} : vector<8x384xf32> to vector<8x128xf32>
    %127 = arith.addf %125, %126 : vector<8x128xf32>
    %128 = arith.negf %127 : vector<8x128xf32>
    %129 = math.exp %128 : vector<8x128xf32>
    %cst_32 = arith.constant 1.000000e+00 : f32
    %130 = vector.broadcast %cst_32 : f32 to vector<8x128xf32>
    %131 = arith.addf %130, %129 : vector<8x128xf32>
    %132 = arith.divf %130, %131 : vector<8x128xf32>
    %133 = vector.extract_strided_slice %122 {offsets = [0, 128], sizes = [8, 128], strides = [1, 1]} : vector<8x384xf32> to vector<8x128xf32>
    %134 = vector.extract_strided_slice %124 {offsets = [0, 128], sizes = [8, 128], strides = [1, 1]} : vector<8x384xf32> to vector<8x128xf32>
    %135 = arith.addf %133, %134 : vector<8x128xf32>
    %136 = arith.negf %135 : vector<8x128xf32>
    %137 = math.exp %136 : vector<8x128xf32>
    %cst_33 = arith.constant 1.000000e+00 : f32
    %138 = vector.broadcast %cst_33 : f32 to vector<8x128xf32>
    %139 = arith.addf %138, %137 : vector<8x128xf32>
    %140 = arith.divf %138, %139 : vector<8x128xf32>
    %141 = vector.extract_strided_slice %122 {offsets = [0, 256], sizes = [8, 128], strides = [1, 1]} : vector<8x384xf32> to vector<8x128xf32>
    %142 = vector.extract_strided_slice %124 {offsets = [0, 256], sizes = [8, 128], strides = [1, 1]} : vector<8x384xf32> to vector<8x128xf32>
    %143 = vector.broadcast %5 : vector<1x128xf32> to vector<8x128xf32>
    %144 = arith.addf %142, %143 : vector<8x128xf32>
    %145 = arith.mulf %132, %144 : vector<8x128xf32>
    %146 = arith.addf %141, %145 : vector<8x128xf32>
    %147 = math.tanh %146 : vector<8x128xf32>
    %148 = arith.subf %113, %147 : vector<8x128xf32>
    %149 = arith.mulf %140, %148 : vector<8x128xf32>
    %150 = arith.addf %147, %149 : vector<8x128xf32>
    %151 = vector.shape_cast %150 : vector<8x128xf32> to vector<1x8x128xf32>
    %152 = arith.truncf %151 : vector<1x8x128xf32> to vector<1x8x128xbf16>
    %153 = arith.index_cast %c3_i32 : i32 to index
    %c0_34 = arith.constant 0 : index
    %c0_35 = arith.constant 0 : index
    %154 = vector.load %arg6[%153, %c0_34, %c0_35] : memref<8x8x128xbf16, #tpu.memory_space<vmem>>, vector<1x8x128xbf16>
    tpu.vector_store %arg6[%153, %c0_34, %c0_35], %152 {strides = array<i32>} : memref<8x8x128xbf16, #tpu.memory_space<vmem>>, vector<1x8x128xbf16>,
    %c4_i32 = arith.constant 4 : i32
    %155 = arith.index_cast %c4_i32 : i32 to index
    %c0_36 = arith.constant 0 : index
    %c0_37 = arith.constant 0 : index
    %156 = vector.load %arg1[%155, %c0_36, %c0_37] : memref<8x8x384xbf16, #tpu.memory_space<vmem>>, vector<1x8x384xbf16>
    %157 = vector.shape_cast %156 : vector<1x8x384xbf16> to vector<8x384xbf16>
    %158 = arith.extf %157 : vector<8x384xbf16> to vector<8x384xf32>
    %159 = arith.addf %158, %4 : vector<8x384xf32>
    %160 = arith.truncf %150 : vector<8x128xf32> to vector<8x128xbf16>
    %cst_38 = arith.constant dense<0.000000e+00> : vector<8x384xf32>
    %161 = tpu.matmul %160, %3, %cst_38 {dimension_numbers = #tpu.dot_dimension_numbers<[1], [0], [0], [1], [0, 0, 1, 1], [], []>} : vector<8x128xbf16>, vector<128x384xbf16>, vector<8x384xf32> -> vector<8x384xf32>
    %162 = vector.extract_strided_slice %159 {offsets = [0, 0], sizes = [8, 128], strides = [1, 1]} : vector<8x384xf32> to vector<8x128xf32>
    %163 = vector.extract_strided_slice %161 {offsets = [0, 0], sizes = [8, 128], strides = [1, 1]} : vector<8x384xf32> to vector<8x128xf32>
    %164 = arith.addf %162, %163 : vector<8x128xf32>
    %165 = arith.negf %164 : vector<8x128xf32>
    %166 = math.exp %165 : vector<8x128xf32>
    %cst_39 = arith.constant 1.000000e+00 : f32
    %167 = vector.broadcast %cst_39 : f32 to vector<8x128xf32>
    %168 = arith.addf %167, %166 : vector<8x128xf32>
    %169 = arith.divf %167, %168 : vector<8x128xf32>
    %170 = vector.extract_strided_slice %159 {offsets = [0, 128], sizes = [8, 128], strides = [1, 1]} : vector<8x384xf32> to vector<8x128xf32>
    %171 = vector.extract_strided_slice %161 {offsets = [0, 128], sizes = [8, 128], strides = [1, 1]} : vector<8x384xf32> to vector<8x128xf32>
    %172 = arith.addf %170, %171 : vector<8x128xf32>
    %173 = arith.negf %172 : vector<8x128xf32>
    %174 = math.exp %173 : vector<8x128xf32>
    %cst_40 = arith.constant 1.000000e+00 : f32
    %175 = vector.broadcast %cst_40 : f32 to vector<8x128xf32>
    %176 = arith.addf %175, %174 : vector<8x128xf32>
    %177 = arith.divf %175, %176 : vector<8x128xf32>
    %178 = vector.extract_strided_slice %159 {offsets = [0, 256], sizes = [8, 128], strides = [1, 1]} : vector<8x384xf32> to vector<8x128xf32>
    %179 = vector.extract_strided_slice %161 {offsets = [0, 256], sizes = [8, 128], strides = [1, 1]} : vector<8x384xf32> to vector<8x128xf32>
    %180 = vector.broadcast %5 : vector<1x128xf32> to vector<8x128xf32>
    %181 = arith.addf %179, %180 : vector<8x128xf32>
    %182 = arith.mulf %169, %181 : vector<8x128xf32>
    %183 = arith.addf %178, %182 : vector<8x128xf32>
    %184 = math.tanh %183 : vector<8x128xf32>
    %185 = arith.subf %150, %184 : vector<8x128xf32>
    %186 = arith.mulf %177, %185 : vector<8x128xf32>
    %187 = arith.addf %184, %186 : vector<8x128xf32>
    %188 = vector.shape_cast %187 : vector<8x128xf32> to vector<1x8x128xf32>
    %189 = arith.truncf %188 : vector<1x8x128xf32> to vector<1x8x128xbf16>
    %190 = arith.index_cast %c4_i32 : i32 to index
    %c0_41 = arith.constant 0 : index
    %c0_42 = arith.constant 0 : index
    %191 = vector.load %arg6[%190, %c0_41, %c0_42] : memref<8x8x128xbf16, #tpu.memory_space<vmem>>, vector<1x8x128xbf16>
    tpu.vector_store %arg6[%190, %c0_41, %c0_42], %189 {strides = array<i32>} : memref<8x8x128xbf16, #tpu.memory_space<vmem>>, vector<1x8x128xbf16>,
    %c5_i32 = arith.constant 5 : i32
    %192 = arith.index_cast %c5_i32 : i32 to index
    %c0_43 = arith.constant 0 : index
    %c0_44 = arith.constant 0 : index
    %193 = vector.load %arg1[%192, %c0_43, %c0_44] : memref<8x8x384xbf16, #tpu.memory_space<vmem>>, vector<1x8x384xbf16>
    %194 = vector.shape_cast %193 : vector<1x8x384xbf16> to vector<8x384xbf16>
    %195 = arith.extf %194 : vector<8x384xbf16> to vector<8x384xf32>
    %196 = arith.addf %195, %4 : vector<8x384xf32>
    %197 = arith.truncf %187 : vector<8x128xf32> to vector<8x128xbf16>
    %cst_45 = arith.constant dense<0.000000e+00> : vector<8x384xf32>
    %198 = tpu.matmul %197, %3, %cst_45 {dimension_numbers = #tpu.dot_dimension_numbers<[1], [0], [0], [1], [0, 0, 1, 1], [], []>} : vector<8x128xbf16>, vector<128x384xbf16>, vector<8x384xf32> -> vector<8x384xf32>
    %199 = vector.extract_strided_slice %196 {offsets = [0, 0], sizes = [8, 128], strides = [1, 1]} : vector<8x384xf32> to vector<8x128xf32>
    %200 = vector.extract_strided_slice %198 {offsets = [0, 0], sizes = [8, 128], strides = [1, 1]} : vector<8x384xf32> to vector<8x128xf32>
    %201 = arith.addf %199, %200 : vector<8x128xf32>
    %202 = arith.negf %201 : vector<8x128xf32>
    %203 = math.exp %202 : vector<8x128xf32>
    %cst_46 = arith.constant 1.000000e+00 : f32
    %204 = vector.broadcast %cst_46 : f32 to vector<8x128xf32>
    %205 = arith.addf %204, %203 : vector<8x128xf32>
    %206 = arith.divf %204, %205 : vector<8x128xf32>
    %207 = vector.extract_strided_slice %196 {offsets = [0, 128], sizes = [8, 128], strides = [1, 1]} : vector<8x384xf32> to vector<8x128xf32>
    %208 = vector.extract_strided_slice %198 {offsets = [0, 128], sizes = [8, 128], strides = [1, 1]} : vector<8x384xf32> to vector<8x128xf32>
    %209 = arith.addf %207, %208 : vector<8x128xf32>
    %210 = arith.negf %209 : vector<8x128xf32>
    %211 = math.exp %210 : vector<8x128xf32>
    %cst_47 = arith.constant 1.000000e+00 : f32
    %212 = vector.broadcast %cst_47 : f32 to vector<8x128xf32>
    %213 = arith.addf %212, %211 : vector<8x128xf32>
    %214 = arith.divf %212, %213 : vector<8x128xf32>
    %215 = vector.extract_strided_slice %196 {offsets = [0, 256], sizes = [8, 128], strides = [1, 1]} : vector<8x384xf32> to vector<8x128xf32>
    %216 = vector.extract_strided_slice %198 {offsets = [0, 256], sizes = [8, 128], strides = [1, 1]} : vector<8x384xf32> to vector<8x128xf32>
    %217 = vector.broadcast %5 : vector<1x128xf32> to vector<8x128xf32>
    %218 = arith.addf %216, %217 : vector<8x128xf32>
    %219 = arith.mulf %206, %218 : vector<8x128xf32>
    %220 = arith.addf %215, %219 : vector<8x128xf32>
    %221 = math.tanh %220 : vector<8x128xf32>
    %222 = arith.subf %187, %221 : vector<8x128xf32>
    %223 = arith.mulf %214, %222 : vector<8x128xf32>
    %224 = arith.addf %221, %223 : vector<8x128xf32>
    %225 = vector.shape_cast %224 : vector<8x128xf32> to vector<1x8x128xf32>
    %226 = arith.truncf %225 : vector<1x8x128xf32> to vector<1x8x128xbf16>
    %227 = arith.index_cast %c5_i32 : i32 to index
    %c0_48 = arith.constant 0 : index
    %c0_49 = arith.constant 0 : index
    %228 = vector.load %arg6[%227, %c0_48, %c0_49] : memref<8x8x128xbf16, #tpu.memory_space<vmem>>, vector<1x8x128xbf16>
    tpu.vector_store %arg6[%227, %c0_48, %c0_49], %226 {strides = array<i32>} : memref<8x8x128xbf16, #tpu.memory_space<vmem>>, vector<1x8x128xbf16>,
    %c6_i32 = arith.constant 6 : i32
    %229 = arith.index_cast %c6_i32 : i32 to index
    %c0_50 = arith.constant 0 : index
    %c0_51 = arith.constant 0 : index
    %230 = vector.load %arg1[%229, %c0_50, %c0_51] : memref<8x8x384xbf16, #tpu.memory_space<vmem>>, vector<1x8x384xbf16>
    %231 = vector.shape_cast %230 : vector<1x8x384xbf16> to vector<8x384xbf16>
    %232 = arith.extf %231 : vector<8x384xbf16> to vector<8x384xf32>
    %233 = arith.addf %232, %4 : vector<8x384xf32>
    %234 = arith.truncf %224 : vector<8x128xf32> to vector<8x128xbf16>
    %cst_52 = arith.constant dense<0.000000e+00> : vector<8x384xf32>
    %235 = tpu.matmul %234, %3, %cst_52 {dimension_numbers = #tpu.dot_dimension_numbers<[1], [0], [0], [1], [0, 0, 1, 1], [], []>} : vector<8x128xbf16>, vector<128x384xbf16>, vector<8x384xf32> -> vector<8x384xf32>
    %236 = vector.extract_strided_slice %233 {offsets = [0, 0], sizes = [8, 128], strides = [1, 1]} : vector<8x384xf32> to vector<8x128xf32>
    %237 = vector.extract_strided_slice %235 {offsets = [0, 0], sizes = [8, 128], strides = [1, 1]} : vector<8x384xf32> to vector<8x128xf32>
    %238 = arith.addf %236, %237 : vector<8x128xf32>
    %239 = arith.negf %238 : vector<8x128xf32>
    %240 = math.exp %239 : vector<8x128xf32>
    %cst_53 = arith.constant 1.000000e+00 : f32
    %241 = vector.broadcast %cst_53 : f32 to vector<8x128xf32>
    %242 = arith.addf %241, %240 : vector<8x128xf32>
    %243 = arith.divf %241, %242 : vector<8x128xf32>
    %244 = vector.extract_strided_slice %233 {offsets = [0, 128], sizes = [8, 128], strides = [1, 1]} : vector<8x384xf32> to vector<8x128xf32>
    %245 = vector.extract_strided_slice %235 {offsets = [0, 128], sizes = [8, 128], strides = [1, 1]} : vector<8x384xf32> to vector<8x128xf32>
    %246 = arith.addf %244, %245 : vector<8x128xf32>
    %247 = arith.negf %246 : vector<8x128xf32>
    %248 = math.exp %247 : vector<8x128xf32>
    %cst_54 = arith.constant 1.000000e+00 : f32
    %249 = vector.broadcast %cst_54 : f32 to vector<8x128xf32>
    %250 = arith.addf %249, %248 : vector<8x128xf32>
    %251 = arith.divf %249, %250 : vector<8x128xf32>
    %252 = vector.extract_strided_slice %233 {offsets = [0, 256], sizes = [8, 128], strides = [1, 1]} : vector<8x384xf32> to vector<8x128xf32>
    %253 = vector.extract_strided_slice %235 {offsets = [0, 256], sizes = [8, 128], strides = [1, 1]} : vector<8x384xf32> to vector<8x128xf32>
    %254 = vector.broadcast %5 : vector<1x128xf32> to vector<8x128xf32>
    %255 = arith.addf %253, %254 : vector<8x128xf32>
    %256 = arith.mulf %243, %255 : vector<8x128xf32>
    %257 = arith.addf %252, %256 : vector<8x128xf32>
    %258 = math.tanh %257 : vector<8x128xf32>
    %259 = arith.subf %224, %258 : vector<8x128xf32>
    %260 = arith.mulf %251, %259 : vector<8x128xf32>
    %261 = arith.addf %258, %260 : vector<8x128xf32>
    %262 = vector.shape_cast %261 : vector<8x128xf32> to vector<1x8x128xf32>
    %263 = arith.truncf %262 : vector<1x8x128xf32> to vector<1x8x128xbf16>
    %264 = arith.index_cast %c6_i32 : i32 to index
    %c0_55 = arith.constant 0 : index
    %c0_56 = arith.constant 0 : index
    %265 = vector.load %arg6[%264, %c0_55, %c0_56] : memref<8x8x128xbf16, #tpu.memory_space<vmem>>, vector<1x8x128xbf16>
    tpu.vector_store %arg6[%264, %c0_55, %c0_56], %263 {strides = array<i32>} : memref<8x8x128xbf16, #tpu.memory_space<vmem>>, vector<1x8x128xbf16>,
    %c7_i32 = arith.constant 7 : i32
    %266 = arith.index_cast %c7_i32 : i32 to index
    %c0_57 = arith.constant 0 : index
    %c0_58 = arith.constant 0 : index
    %267 = vector.load %arg1[%266, %c0_57, %c0_58] : memref<8x8x384xbf16, #tpu.memory_space<vmem>>, vector<1x8x384xbf16>
    %268 = vector.shape_cast %267 : vector<1x8x384xbf16> to vector<8x384xbf16>
    %269 = arith.extf %268 : vector<8x384xbf16> to vector<8x384xf32>
    %270 = arith.addf %269, %4 : vector<8x384xf32>
    %271 = arith.truncf %261 : vector<8x128xf32> to vector<8x128xbf16>
    %cst_59 = arith.constant dense<0.000000e+00> : vector<8x384xf32>
    %272 = tpu.matmul %271, %3, %cst_59 {dimension_numbers = #tpu.dot_dimension_numbers<[1], [0], [0], [1], [0, 0, 1, 1], [], []>} : vector<8x128xbf16>, vector<128x384xbf16>, vector<8x384xf32> -> vector<8x384xf32>
    %273 = vector.extract_strided_slice %270 {offsets = [0, 0], sizes = [8, 128], strides = [1, 1]} : vector<8x384xf32> to vector<8x128xf32>
    %274 = vector.extract_strided_slice %272 {offsets = [0, 0], sizes = [8, 128], strides = [1, 1]} : vector<8x384xf32> to vector<8x128xf32>
    %275 = arith.addf %273, %274 : vector<8x128xf32>
    %276 = arith.negf %275 : vector<8x128xf32>
    %277 = math.exp %276 : vector<8x128xf32>
    %cst_60 = arith.constant 1.000000e+00 : f32
    %278 = vector.broadcast %cst_60 : f32 to vector<8x128xf32>
    %279 = arith.addf %278, %277 : vector<8x128xf32>
    %280 = arith.divf %278, %279 : vector<8x128xf32>
    %281 = vector.extract_strided_slice %270 {offsets = [0, 128], sizes = [8, 128], strides = [1, 1]} : vector<8x384xf32> to vector<8x128xf32>
    %282 = vector.extract_strided_slice %272 {offsets = [0, 128], sizes = [8, 128], strides = [1, 1]} : vector<8x384xf32> to vector<8x128xf32>
    %283 = arith.addf %281, %282 : vector<8x128xf32>
    %284 = arith.negf %283 : vector<8x128xf32>
    %285 = math.exp %284 : vector<8x128xf32>
    %cst_61 = arith.constant 1.000000e+00 : f32
    %286 = vector.broadcast %cst_61 : f32 to vector<8x128xf32>
    %287 = arith.addf %286, %285 : vector<8x128xf32>
    %288 = arith.divf %286, %287 : vector<8x128xf32>
    %289 = vector.extract_strided_slice %270 {offsets = [0, 256], sizes = [8, 128], strides = [1, 1]} : vector<8x384xf32> to vector<8x128xf32>
    %290 = vector.extract_strided_slice %272 {offsets = [0, 256], sizes = [8, 128], strides = [1, 1]} : vector<8x384xf32> to vector<8x128xf32>
    %291 = vector.broadcast %5 : vector<1x128xf32> to vector<8x128xf32>
    %292 = arith.addf %290, %291 : vector<8x128xf32>
    %293 = arith.mulf %280, %292 : vector<8x128xf32>
    %294 = arith.addf %289, %293 : vector<8x128xf32>
    %295 = math.tanh %294 : vector<8x128xf32>
    %296 = arith.subf %261, %295 : vector<8x128xf32>
    %297 = arith.mulf %288, %296 : vector<8x128xf32>
    %298 = arith.addf %295, %297 : vector<8x128xf32>
    %299 = vector.shape_cast %298 : vector<8x128xf32> to vector<1x8x128xf32>
    %300 = arith.truncf %299 : vector<1x8x128xf32> to vector<1x8x128xbf16>
    %301 = arith.index_cast %c7_i32 : i32 to index
    %c0_62 = arith.constant 0 : index
    %c0_63 = arith.constant 0 : index
    %302 = vector.load %arg6[%301, %c0_62, %c0_63] : memref<8x8x128xbf16, #tpu.memory_space<vmem>>, vector<1x8x128xbf16>
    tpu.vector_store %arg6[%301, %c0_62, %c0_63], %300 {strides = array<i32>} : memref<8x8x128xbf16, #tpu.memory_space<vmem>>, vector<1x8x128xbf16>,
    %c8_i32 = arith.constant 8 : i32
    %c0_64 = arith.constant 0 : index
    %c0_65 = arith.constant 0 : index
    %303 = vector.load %arg8[%c0_64, %c0_65] : memref<8x128xf32, #tpu.memory_space<vmem>>, vector<8x128xf32>
    tpu.vector_store %arg8[%c0_64, %c0_65], %298 {strides = array<i32>} : memref<8x128xf32, #tpu.memory_space<vmem>>, vector<8x128xf32>,
    %c0_i32_66 = arith.constant 0 : i32
    %304 = arith.cmpi eq, %arg0, %c0_i32_66 : i32
    %305 = arith.extui %304 : i1 to i32
    %c0_i32_67 = arith.constant 0 : i32
    %306 = arith.cmpi ne, %305, %c0_i32_67 : i32
    scf.if %306 {
      %c0_68 = arith.constant 0 : index
      %c0_69 = arith.constant 0 : index
      %307 = vector.load %arg7[%c0_68, %c0_69] : memref<8x128xf32, #tpu.memory_space<vmem>>, vector<8x128xf32>
      tpu.vector_store %arg7[%c0_68, %c0_69], %298 {strides = array<i32>} : memref<8x128xf32, #tpu.memory_space<vmem>>, vector<8x128xf32>,
    } else {
    }
    return
  }
  func.func @transform_0(%arg0: i32) -> (i32, i32, i32) {
    %c0_i32 = arith.constant 0 : i32
    %c0_i32_0 = arith.constant 0 : i32
    %c0_i32_1 = arith.constant 0 : i32
    return %arg0, %c0_i32, %c0_i32_0 : i32, i32, i32
  }
  func.func @transform_1(%arg0: i32) -> (i32, i32) {
    %c0_i32 = arith.constant 0 : i32
    %c0_i32_0 = arith.constant 0 : i32
    %c0_i32_1 = arith.constant 0 : i32
    return %c0_i32, %c0_i32_0 : i32, i32
  }
  func.func @transform_2(%arg0: i32) -> (i32, i32) {
    %c0_i32 = arith.constant 0 : i32
    %c0_i32_0 = arith.constant 0 : i32
    %c0_i32_1 = arith.constant 0 : i32
    return %c0_i32, %c0_i32_0 : i32, i32
  }
  func.func @transform_3(%arg0: i32) -> (i32, i32) {
    %c0_i32 = arith.constant 0 : i32
    %c0_i32_0 = arith.constant 0 : i32
    %c0_i32_1 = arith.constant 0 : i32
    return %c0_i32, %c0_i32_0 : i32, i32
  }
  func.func @transform_4(%arg0: i32) -> (i32, i32) {
    %c0_i32 = arith.constant 0 : i32
    %c0_i32_0 = arith.constant 0 : i32
    %c0_i32_1 = arith.constant 0 : i32
    return %c0_i32, %c0_i32_0 : i32, i32
  }
  func.func @transform_5(%arg0: i32) -> (i32, i32, i32) {
    %c0_i32 = arith.constant 0 : i32
    %c0_i32_0 = arith.constant 0 : i32
    %c0_i32_1 = arith.constant 0 : i32
    return %arg0, %c0_i32, %c0_i32_0 : i32, i32, i32
  }
  func.func @transform_6(%arg0: i32) -> (i32, i32) {
    %c0_i32 = arith.constant 0 : i32
    %c0_i32_0 = arith.constant 0 : i32
    %c0_i32_1 = arith.constant 0 : i32
    return %c0_i32, %c0_i32_0 : i32, i32
  }
}

module attributes {stable_mosaic.version = 11 : i64} {
  func.func @_matmul_bias_kernel(%arg0: i32, %arg1: i32, %arg2: memref<64x128xbf16, #tpu.memory_space<vmem>>, %arg3: memref<128x384xbf16, #tpu.memory_space<vmem>>, %arg4: memref<1x384xf32, #tpu.memory_space<vmem>>, %arg5: memref<64x384xbf16, #tpu.memory_space<vmem>>) attributes {dimension_semantics = [#tpu.dimension_semantics<parallel>, #tpu.dimension_semantics<parallel>], iteration_bounds = array<i64: 1, 1>, scalar_prefetch = 0 : i64, scratch_operands = 0 : i64, tpu.core_type = #tpu.core_type<tc>, window_params = [{transform_indices = @transform_0, window_bounds = array<i64: 64, 128>}, {transform_indices = @transform_1, window_bounds = array<i64: 128, 384>}, {transform_indices = @transform_2, window_bounds = array<i64: 1, 384>}, {transform_indices = @transform_3, window_bounds = array<i64: 64, 384>}]} {
    %c0 = arith.constant 0 : index
    %c0_0 = arith.constant 0 : index
    %0 = vector.load %arg2[%c0, %c0_0] : memref<64x128xbf16, #tpu.memory_space<vmem>>, vector<64x128xbf16>
    %c0_1 = arith.constant 0 : index
    %c0_2 = arith.constant 0 : index
    %1 = vector.load %arg3[%c0_1, %c0_2] : memref<128x384xbf16, #tpu.memory_space<vmem>>, vector<128x384xbf16>
    %cst = arith.constant dense<0.000000e+00> : vector<64x384xf32>
    %2 = tpu.matmul %0, %1, %cst {dimension_numbers = #tpu.dot_dimension_numbers<[1], [0], [0], [1], [0, 0, 1, 1], [], []>} : vector<64x128xbf16>, vector<128x384xbf16>, vector<64x384xf32> -> vector<64x384xf32>
    %c0_3 = arith.constant 0 : index
    %c0_4 = arith.constant 0 : index
    %3 = vector.load %arg4[%c0_3, %c0_4] : memref<1x384xf32, #tpu.memory_space<vmem>>, vector<1x384xf32>
    %4 = vector.broadcast %3 : vector<1x384xf32> to vector<64x384xf32>
    %5 = arith.addf %2, %4 : vector<64x384xf32>
    %6 = arith.truncf %5 : vector<64x384xf32> to vector<64x384xbf16>
    %c0_5 = arith.constant 0 : index
    %c0_6 = arith.constant 0 : index
    %7 = vector.load %arg5[%c0_5, %c0_6] : memref<64x384xbf16, #tpu.memory_space<vmem>>, vector<64x384xbf16>
    tpu.vector_store %arg5[%c0_5, %c0_6], %6 {strides = array<i32>} : memref<64x384xbf16, #tpu.memory_space<vmem>>, vector<64x384xbf16>,
    return
  }
  func.func @transform_0(%arg0: i32, %arg1: i32) -> (i32, i32) {
    %c0_i32 = arith.constant 0 : i32
    %c0_i32_0 = arith.constant 0 : i32
    return %arg0, %c0_i32 : i32, i32
  }
  func.func @transform_1(%arg0: i32, %arg1: i32) -> (i32, i32) {
    %c0_i32 = arith.constant 0 : i32
    %c0_i32_0 = arith.constant 0 : i32
    return %c0_i32, %arg1 : i32, i32
  }
  func.func @transform_2(%arg0: i32, %arg1: i32) -> (i32, i32) {
    %c0_i32 = arith.constant 0 : i32
    %c0_i32_0 = arith.constant 0 : i32
    return %c0_i32, %arg1 : i32, i32
  }
  func.func @transform_3(%arg0: i32, %arg1: i32) -> (i32, i32) {
    %c0_i32 = arith.constant 0 : i32
    return %arg0, %arg1 : i32, i32
  }
}

module attributes {stable_mosaic.version = 11 : i64} {
  func.func @_matmul_bias_kernel(%arg0: i32, %arg1: i32, %arg2: memref<8x128xbf16, #tpu.memory_space<vmem>>, %arg3: memref<128x384xbf16, #tpu.memory_space<vmem>>, %arg4: memref<1x384xf32, #tpu.memory_space<vmem>>, %arg5: memref<8x384xf32, #tpu.memory_space<vmem>>) attributes {dimension_semantics = [#tpu.dimension_semantics<parallel>, #tpu.dimension_semantics<parallel>], iteration_bounds = array<i64: 1, 1>, scalar_prefetch = 0 : i64, scratch_operands = 0 : i64, tpu.core_type = #tpu.core_type<tc>, window_params = [{transform_indices = @transform_0, window_bounds = array<i64: 8, 128>}, {transform_indices = @transform_1, window_bounds = array<i64: 128, 384>}, {transform_indices = @transform_2, window_bounds = array<i64: 1, 384>}, {transform_indices = @transform_3, window_bounds = array<i64: 8, 384>}]} {
    %c0 = arith.constant 0 : index
    %c0_0 = arith.constant 0 : index
    %0 = vector.load %arg2[%c0, %c0_0] : memref<8x128xbf16, #tpu.memory_space<vmem>>, vector<8x128xbf16>
    %c0_1 = arith.constant 0 : index
    %c0_2 = arith.constant 0 : index
    %1 = vector.load %arg3[%c0_1, %c0_2] : memref<128x384xbf16, #tpu.memory_space<vmem>>, vector<128x384xbf16>
    %cst = arith.constant dense<0.000000e+00> : vector<8x384xf32>
    %2 = tpu.matmul %0, %1, %cst {dimension_numbers = #tpu.dot_dimension_numbers<[1], [0], [0], [1], [0, 0, 1, 1], [], []>} : vector<8x128xbf16>, vector<128x384xbf16>, vector<8x384xf32> -> vector<8x384xf32>
    %c0_3 = arith.constant 0 : index
    %c0_4 = arith.constant 0 : index
    %3 = vector.load %arg4[%c0_3, %c0_4] : memref<1x384xf32, #tpu.memory_space<vmem>>, vector<1x384xf32>
    %4 = vector.broadcast %3 : vector<1x384xf32> to vector<8x384xf32>
    %5 = arith.addf %2, %4 : vector<8x384xf32>
    %c0_5 = arith.constant 0 : index
    %c0_6 = arith.constant 0 : index
    %6 = vector.load %arg5[%c0_5, %c0_6] : memref<8x384xf32, #tpu.memory_space<vmem>>, vector<8x384xf32>
    tpu.vector_store %arg5[%c0_5, %c0_6], %5 {strides = array<i32>} : memref<8x384xf32, #tpu.memory_space<vmem>>, vector<8x384xf32>,
    return
  }
  func.func @transform_0(%arg0: i32, %arg1: i32) -> (i32, i32) {
    %c0_i32 = arith.constant 0 : i32
    %c0_i32_0 = arith.constant 0 : i32
    return %arg0, %c0_i32 : i32, i32
  }
  func.func @transform_1(%arg0: i32, %arg1: i32) -> (i32, i32) {
    %c0_i32 = arith.constant 0 : i32
    %c0_i32_0 = arith.constant 0 : i32
    return %c0_i32, %arg1 : i32, i32
  }
  func.func @transform_2(%arg0: i32, %arg1: i32) -> (i32, i32) {
    %c0_i32 = arith.constant 0 : i32
    %c0_i32_0 = arith.constant 0 : i32
    return %c0_i32, %arg1 : i32, i32
  }
  func.func @transform_3(%arg0: i32, %arg1: i32) -> (i32, i32) {
    %c0_i32 = arith.constant 0 : i32
    return %arg0, %arg1 : i32, i32
  }
}

module attributes {stable_mosaic.version = 11 : i64} {
  func.func @_matmul_bias_kernel(%arg0: i32, %arg1: i32, %arg2: memref<64x128xbf16, #tpu.memory_space<vmem>>, %arg3: memref<128x128xbf16, #tpu.memory_space<vmem>>, %arg4: memref<1x128xf32, #tpu.memory_space<vmem>>, %arg5: memref<64x128xf32, #tpu.memory_space<vmem>>) attributes {dimension_semantics = [#tpu.dimension_semantics<parallel>, #tpu.dimension_semantics<parallel>], iteration_bounds = array<i64: 1, 1>, scalar_prefetch = 0 : i64, scratch_operands = 0 : i64, tpu.core_type = #tpu.core_type<tc>, window_params = [{transform_indices = @transform_0, window_bounds = array<i64: 64, 128>}, {transform_indices = @transform_1, window_bounds = array<i64: 128, 128>}, {transform_indices = @transform_2, window_bounds = array<i64: 1, 128>}, {transform_indices = @transform_3, window_bounds = array<i64: 64, 128>}]} {
    %c0 = arith.constant 0 : index
    %c0_0 = arith.constant 0 : index
    %0 = vector.load %arg2[%c0, %c0_0] : memref<64x128xbf16, #tpu.memory_space<vmem>>, vector<64x128xbf16>
    %c0_1 = arith.constant 0 : index
    %c0_2 = arith.constant 0 : index
    %1 = vector.load %arg3[%c0_1, %c0_2] : memref<128x128xbf16, #tpu.memory_space<vmem>>, vector<128x128xbf16>
    %cst = arith.constant dense<0.000000e+00> : vector<64x128xf32>
    %2 = tpu.matmul %0, %1, %cst {dimension_numbers = #tpu.dot_dimension_numbers<[1], [0], [0], [1], [0, 0, 1, 1], [], []>} : vector<64x128xbf16>, vector<128x128xbf16>, vector<64x128xf32> -> vector<64x128xf32>
    %c0_3 = arith.constant 0 : index
    %c0_4 = arith.constant 0 : index
    %3 = vector.load %arg4[%c0_3, %c0_4] : memref<1x128xf32, #tpu.memory_space<vmem>>, vector<1x128xf32>
    %4 = vector.broadcast %3 : vector<1x128xf32> to vector<64x128xf32>
    %5 = arith.addf %2, %4 : vector<64x128xf32>
    %c0_5 = arith.constant 0 : index
    %c0_6 = arith.constant 0 : index
    %6 = vector.load %arg5[%c0_5, %c0_6] : memref<64x128xf32, #tpu.memory_space<vmem>>, vector<64x128xf32>
    tpu.vector_store %arg5[%c0_5, %c0_6], %5 {strides = array<i32>} : memref<64x128xf32, #tpu.memory_space<vmem>>, vector<64x128xf32>,
    return
  }
  func.func @transform_0(%arg0: i32, %arg1: i32) -> (i32, i32) {
    %c0_i32 = arith.constant 0 : i32
    %c0_i32_0 = arith.constant 0 : i32
    return %arg0, %c0_i32 : i32, i32
  }
  func.func @transform_1(%arg0: i32, %arg1: i32) -> (i32, i32) {
    %c0_i32 = arith.constant 0 : i32
    %c0_i32_0 = arith.constant 0 : i32
    return %c0_i32, %arg1 : i32, i32
  }
  func.func @transform_2(%arg0: i32, %arg1: i32) -> (i32, i32) {
    %c0_i32 = arith.constant 0 : i32
    %c0_i32_0 = arith.constant 0 : i32
    return %c0_i32, %arg1 : i32, i32
  }
  func.func @transform_3(%arg0: i32, %arg1: i32) -> (i32, i32) {
    %c0_i32 = arith.constant 0 : i32
    return %arg0, %arg1 : i32, i32
  }
}

</mosaic_0001>

<bundles_post_ra>
// kernel: seq2seq_decoder_forward.7
= control target key start
LH: loop header
LB: loop body
LE: loop exit
PB: predicated region body
PF: predicated region fallthrough
CT: control target
= control target key end

     0   :  { %v595_v1 = vmov 0   ;;  %v57_v29 = vlaneseq  ;;  %s775_s1 = inlined_call_operand.vmem [shape: bf16[128,384], index: 1, kind: input, shape index: {}]   ;;  %s776_s0 = inlined_call_operand.vmem [shape: bf16[64,128], index: 0, kind: input, shape index: {}]   ;;  %s777_s2 = inlined_call_operand.vmem [shape: f32[1,384], index: 2, kind: input, shape index: {}]   ;;  %s778_s3 = inlined_call_operand.vmem [shape: bf16[64,384], index: 3, kind: output, shape index: {}]  }
   0x1   :  { %v559_v0 = vld [vmem:[%s775_s1 + $0x4] ss:$12 sps:$4 sm:$0xff]   ;;  %256 = vmatprep.mubr.bf16.mxu0 %v595_v1  ;;  %v561_v2 = vld [vmem:[%s775_s1] ss:$12 sps:$4 sm:$0xff]   ;;  %v562_v3 = vld [vmem:[%s775_s1 + $0x1c] ss:$12 sps:$4 sm:$0xff]  }
   0x2   :  { %224 = vmatprep.subr.bf16.mxu0 %v559_v0  ;;  %v564_v4 = vld [vmem:[%s775_s1 + $0x18] ss:$12 sps:$4 sm:$0xff]   ;;  %v565_v5 = vld [vmem:[%s775_s1 + $0x34] ss:$12 sps:$4 sm:$0xff]   ;;  %v567_v7 = vld [vmem:[%s775_s1 + $0x30] ss:$12 sps:$4 sm:$0xff]  }
   0x3   :  { %225 = vmatpush1.bf16.msra.mxu0 %v561_v2  ;;  %v571_v6 = vld [vmem:[%s775_s1 + $0x8] ss:$12 sps:$4 sm:$0xff]   ;;  %v568_v8 = vld [vmem:[%s775_s1 + $0x4c] ss:$12 sps:$4 sm:$0xff]   ;;  %v572_v12 = vld [vmem:[%s775_s1 + $0x64] ss:$12 sps:$4 sm:$0xff]  }
   0x4   :  { %226 = vmatprep.subr.bf16.mxu0 %v562_v3  ;;  %534 = vmatprep.subr.bf16.mxu1 %v571_v6  ;;  %v575_v9 = vld [vmem:[%s775_s1 + $0x20] ss:$12 sps:$4 sm:$0xff]   ;;  %v579_v10 = vld [vmem:[%s775_s1 + $0x38] ss:$12 sps:$4 sm:$0xff]   ;;  %v570_v11 = vld [vmem:[%s775_s1 + $0x48] ss:$12 sps:$4 sm:$0xff]  }
   0x5   :  { %535 = vmatpush3.bf16.msra.mxu1 %v571_v6  ;;  %v574_v13 = vld [vmem:[%s775_s1 + $0x60] ss:$12 sps:$4 sm:$0xff]   ;;  %v583_v14 = vld [vmem:[%s775_s1 + $0x50] ss:$12 sps:$4 sm:$0xff]   ;;  %v587_v17 = vld [vmem:[%s775_s1 + $0x68] ss:$12 sps:$4 sm:$0xff]  }
   0x6   :  { %536 = vmatprep.subr.bf16.mxu1 %v575_v9  ;;  %v576_v15 = vld [vmem:[%s775_s1 + $0x7c] ss:$12 sps:$4 sm:$0xff]   ;;  %v588_v16 = vld [vmem:[%s776_s0] sm:$0xff]   ;;  %v584_v22 = vld [vmem:[%s775_s1 + $0xac] ss:$12 sps:$4 sm:$0xff]   ;;  %v58_v30 = vshrl.u32 %v57_v29, 7 }
   0x7   :  { %227 = vmatpush1.bf16.msra.mxu0 %v564_v4  ;;  %550 = vmatprep.mubr.bf16.mxu1 %v588_v16  ;;  %v578_v18 = vld [vmem:[%s775_s1 + $0x78] ss:$12 sps:$4 sm:$0xff]   ;;  %v580_v19 = vld [vmem:[%s775_s1 + $0x94] ss:$12 sps:$4 sm:$0xff]   ;;  %v582_v21 = vld [vmem:[%s775_s1 + $0x90] ss:$12 sps:$4 sm:$0xff]  }
   0x8   :  { %228 = vmatprep.subr.bf16.mxu0 %v565_v5  ;;  %v589_v20 = vld [vmem:[%s775_s1 + $0x80] ss:$12 sps:$4 sm:$0xff]   ;;  %v590_v23 = vld [vmem:[%s775_s1 + $0x98] ss:$12 sps:$4 sm:$0xff]   ;;  %v586_v24 = vld [vmem:[%s775_s1 + $0xa8] ss:$12 sps:$4 sm:$0xff]  }
   0x9   :  { %537 = vmatpush3.bf16.msra.mxu1 %v575_v9  ;;  %v592_v25 = vld [vmem:[%s775_s1 + $0xb0] ss:$12 sps:$4 sm:$0xff]   ;;  %v591_v26 = vld [vmem:[%s776_s0 + $0x8] sm:$0xff]   ;;  %v59_v31 = vsub.s32 0, %v58_v30  ;;  %v55_v32 = vld [vmem:[%s777_s2] sm:$0x7] }
   0xa   :  { %538 = vmatprep.subr.bf16.mxu1 %v579_v10  ;;  %v593_v27 = vld [vmem:[%s776_s0 + $0x10] sm:$0xff]   ;;  %v594_v28 = vld [vmem:[%s776_s0 + $0x18] sm:$0xff]   ;;  %v63_v33 = vsub.s32 1, %v58_v30  ;;  %v67_v36 = vsub.s32 2, %v58_v30 }
   0xb   :  { %229 = vmatpush1.bf16.msra.mxu0 %v567_v7  ;;  %v707_v34 = vrot.slane %v55_v32, %v59_v31 }
   0xc   :  { %230 = vmatprep.subr.bf16.mxu0 %v568_v8  ;;  %v709_v35 = vrot.slane %v55_v32, %v63_v33  ;;  %v68_v44 = vrot.slane %v55_v32, %v67_v36 }
   0xd   :  { %539 = vmatpush3.bf16.msra.mxu1 %v579_v10 }
   0xe   :  { %540 = vmatprep.subr.bf16.mxu1 %v583_v14 }
   0xf   :  { %231 = vmatpush1.bf16.msra.mxu0 %v570_v11 }
  0x10   :  { %232 = vmatprep.subr.bf16.mxu0 %v572_v12 }
  0x11   :  { %541 = vmatpush3.bf16.msra.mxu1 %v583_v14 }
  0x12   :  { %542 = vmatprep.subr.bf16.mxu1 %v587_v17 }
  0x13   :  { %233 = vmatpush1.bf16.msra.mxu0 %v574_v13 }
  0x14   :  { %234 = vmatprep.subr.bf16.mxu0 %v576_v15 }
  0x15   :  { %543 = vmatpush3.bf16.msra.mxu1 %v587_v17 }
  0x16   :  { %544 = vmatprep.subr.bf16.mxu1 %v589_v20 }
  0x17   :  { %235 = vmatpush1.bf16.msra.mxu0 %v578_v18 }
  0x18   :  { %236 = vmatprep.subr.bf16.mxu0 %v580_v19 }
  0x19   :  { %545 = vmatpush3.bf16.msra.mxu1 %v589_v20 }
  0x1a   :  { %546 = vmatprep.subr.bf16.mxu1 %v590_v23 }
  0x1b   :  { %237 = vmatpush1.bf16.msra.mxu0 %v582_v21 }
  0x1c   :  { %238 = vmatprep.subr.bf16.mxu0 %v584_v22 }
  0x1d   :  { %547 = vmatpush3.bf16.msra.mxu1 %v590_v23 }
  0x1e   :  { %548 = vmatprep.subr.bf16.mxu1 %v592_v25 }
  0x1f   :  { %239 = vmatpush1.bf16.msra.mxu0 %v586_v24 }
  0x21   :  { %549 = vmatpush3.bf16.msra.mxu1 %v592_v25 }
  0x22   :  { %257 = vmatmul.mubr.bf16.vlgmr.msra.gmra.mrb[0].mxu0 %v588_v16 }
  0x23   :  { %266 = vmatprep.mubr.bf16.mxu0 %v595_v1 }
  0x24   :  { %551 = vmatmul.mubr.bf16.vlgmr.msra.gmra.mrb[0].mxu1 %v591_v26 }
  0x25   :  { %554 = vmatprep.mubr.bf16.mxu1 %v593_v27 }
  0x2a   :  { %267 = vmatmul.mubr.bf16.gmra.mrb[4].mxu0 %v591_v26 }
  0x2b   :  { %276 = vmatprep.mubr.bf16.mxu0 %v595_v1 }
  0x2c   :  { %555 = vmatmul.mubr.bf16.gmra.mrb[4].mxu1 %v594_v28 }
  0x32   :  { %277 = vmatmul.mubr.bf16.gmra.mrb[8].mxu0 %v593_v27 }
  0x33   :  { %286 = vmatprep.mubr.bf16.mxu0 %v595_v1 }
  0x3a   :  { %287 = vmatmul.mubr.bf16.gmra.mrb[12].mxu0 %v594_v28 }
  0xf5   :  { %v258_v37 = vpop.f32.mrb[0].mxu0 }
  0xf6   :  { %v259_v38 = vadd.f32 %v258_v37, %v707_v34  ;;  %v260_v39 = vpop.f32.mrb[1].mxu0 }
  0xf7   :  { %v261_v40 = vadd.f32 %v260_v39, %v709_v35  ;;  %v262_v41 = vpop.f32.mrb[2].mxu0  ;;  %v552_v48 = vpop.f32.mrb[0].mxu1 }
  0xf8   :  { %v263_v42 = vadd.f32 %v262_v41, %v707_v34  ;;  %v264_v43 = vpop.f32.mrb[3].mxu0  ;;  %v340_v49 = vadd.f32 %v552_v48, %v68_v44  ;;  %v331_v50 = vpop.f32.mrb[1].mxu1 }
  0xf9   :  { %v506_v45 = vpack.c.bf16 %v261_v40, %v259_v38  ;;  %v265_v46 = vadd.f32 %v264_v43, %v709_v35  ;;  %v332_v52 = vadd.f32 %v331_v50, %v68_v44  ;;  %v553_v53 = vpop.f32.mrb[2].mxu1 }
  0xfa   :  { %v511_v56 = vpack.c.bf16 %v340_v49, %v340_v49  ;;  %v343_v57 = vadd.f32 %v553_v53, %v68_v44  ;;  %v334_v58 = vpop.f32.mrb[3].mxu1 }
  0xfb   :  { %442 = vst [vmem:[%s778_s3] sm:$0xff] %v506_v45  ;;  %v508_v47 = vpack.c.bf16 %v265_v46, %v263_v42  ;;  %v507_v61 = vpack.c.bf16 %v332_v52, %v332_v52  ;;  %v335_v62 = vadd.f32 %v334_v58, %v68_v44 }
  0xfc   :  { %447 = vst [vmem:[%s778_s3 + $0x20] sm:$0xf] %v511_v56  ;;  %v513_v1 = vpack.c.bf16 %v343_v57, %v343_v57 }
  0xfd   :  { %444 = vst [vmem:[%s778_s3 + $0xc] sm:$0xff] %v508_v47  ;;  %v268_v51 = vpop.f32.mrb[4].mxu0  ;;  %443 = vst [vmem:[%s778_s3 + $0x8] sm:$0xf] %v507_v61  ;;  %v509_v4 = vpack.c.bf16 %v335_v62, %v335_v62 }
  0xfe   :  { %v269_v54 = vadd.f32 %v268_v51, %v707_v34  ;;  %v270_v55 = vpop.f32.mrb[5].mxu0  ;;  %449 = vst [vmem:[%s778_s3 + $0x2c] sm:$0xf] %v513_v1 }
  0xff   :  { %v271_v59 = vadd.f32 %v270_v55, %v709_v35  ;;  %v272_v60 = vpop.f32.mrb[6].mxu0  ;;  %445 = vst [vmem:[%s778_s3 + $0x14] sm:$0xf] %v509_v4  ;;  %v556_v6 = vpop.f32.mrb[4].mxu1 }
 0x100   :  { %v273_v63 = vadd.f32 %v272_v60, %v707_v34  ;;  %v274_v0 = vpop.f32.mrb[7].mxu0  ;;  %v356_v7 = vadd.f32 %v556_v6, %v68_v44  ;;  %v347_v8 = vpop.f32.mrb[5].mxu1 }
 0x101   :  { %v510_v2 = vpack.c.bf16 %v271_v59, %v269_v54  ;;  %v275_v3 = vadd.f32 %v274_v0, %v709_v35  ;;  %v348_v10 = vadd.f32 %v347_v8, %v68_v44  ;;  %v557_v11 = vpop.f32.mrb[6].mxu1 }
 0x102   :  { %v519_v14 = vpack.c.bf16 %v356_v7, %v356_v7  ;;  %v359_v15 = vadd.f32 %v557_v11, %v68_v44  ;;  %v350_v16 = vpop.f32.mrb[7].mxu1 }
 0x103   :  { %446 = vst [vmem:[%s778_s3 + $0x18] sm:$0xff] %v510_v2  ;;  %v512_v5 = vpack.c.bf16 %v275_v3, %v273_v63  ;;  %v515_v19 = vpack.c.bf16 %v348_v10, %v348_v10  ;;  %v351_v20 = vadd.f32 %v350_v16, %v68_v44 }
 0x104   :  { %455 = vst [vmem:[%s778_s3 + $0x50] sm:$0xf] %v519_v14  ;;  %v521_v23 = vpack.c.bf16 %v359_v15, %v359_v15 }
 0x105   :  { %448 = vst [vmem:[%s778_s3 + $0x24] sm:$0xff] %v512_v5  ;;  %v278_v9 = vpop.f32.mrb[8].mxu0  ;;  %451 = vst [vmem:[%s778_s3 + $0x38] sm:$0xf] %v515_v19  ;;  %v517_v26 = vpack.c.bf16 %v351_v20, %v351_v20 }
 0x106   :  { %v279_v12 = vadd.f32 %v278_v9, %v707_v34  ;;  %v280_v13 = vpop.f32.mrb[9].mxu0  ;;  %457 = vst [vmem:[%s778_s3 + $0x5c] sm:$0xf] %v521_v23 }
 0x107   :  { %v281_v17 = vadd.f32 %v280_v13, %v709_v35  ;;  %v282_v18 = vpop.f32.mrb[10].mxu0  ;;  %453 = vst [vmem:[%s778_s3 + $0x44] sm:$0xf] %v517_v26 }
 0x108   :  { %v283_v21 = vadd.f32 %v282_v18, %v707_v34  ;;  %v284_v22 = vpop.f32.mrb[11].mxu0 }
 0x109   :  { %v514_v24 = vpack.c.bf16 %v281_v17, %v279_v12  ;;  %v285_v25 = vadd.f32 %v284_v22, %v709_v35 }
 0x10b   :  { %450 = vst [vmem:[%s778_s3 + $0x30] sm:$0xff] %v514_v24  ;;  %v516_v27 = vpack.c.bf16 %v285_v25, %v283_v21 }
 0x10d   :  { %452 = vst [vmem:[%s778_s3 + $0x3c] sm:$0xff] %v516_v27  ;;  %v288_v28 = vpop.f32.mrb[12].mxu0 }
 0x10e   :  { %v289_v29 = vadd.f32 %v288_v28, %v707_v34  ;;  %v290_v30 = vpop.f32.mrb[13].mxu0 }
 0x10f   :  { %v291_v31 = vadd.f32 %v290_v30, %v709_v35  ;;  %v292_v32 = vpop.f32.mrb[14].mxu0 }
 0x110   :  { %v293_v33 = vadd.f32 %v292_v32, %v707_v34  ;;  %v294_v36 = vpop.f32.mrb[15].mxu0 }
 0x111   :  { %v518_v37 = vpack.c.bf16 %v291_v31, %v289_v29  ;;  %v295_v38 = vadd.f32 %v294_v36, %v709_v35 }
 0x113   :  { %454 = vst [vmem:[%s778_s3 + $0x48] sm:$0xff] %v518_v37  ;;  %v520_v39 = vpack.c.bf16 %v295_v38, %v293_v33 }
 0x115   :  { %456 = vst [vmem:[%s778_s3 + $0x54] sm:$0xff] %v520_v39 }

// kernel: seq2seq_decoder_forward.6
= control target key start
LH: loop header
LB: loop body
LE: loop exit
PB: predicated region body
PF: predicated region fallthrough
CT: control target
= control target key end

     0   :  { %v369_v0 = vmov 0.0   ;;  %vm370_vm0 = vmmov 0   ;;  %v371_v3 = vmov 0   ;;  %v50_v27 = vlaneseq  ;;  %s479_s1 = inlined_call_operand.vmem [shape: bf16[128,384], index: 1, kind: input, shape index: {}]   ;;  %s480_s0 = inlined_call_operand.vmem [shape: bf16[8,128], index: 0, kind: input, shape index: {}]   ;;  %s481_s2 = inlined_call_operand.vmem [shape: f32[1,384], index: 2, kind: input, shape index: {}]   ;;  %s482_s3 = inlined_call_operand.vmem [shape: f32[8,384], index: 3, kind: output, shape index: {}]  }
   0x1   :  { %314 = vmatprep.subr.bf16.mxu1 %v369_v0  ;;  %v337_v1 = vld [vmem:[%s479_s1 + $0x4] ss:$12 sps:$4 sm:$0xff]   ;;  %330 = vmatprep.mubr.msk.bf16.mxu1 %vm370_vm0, %v369_v0  ;;  %v339_v2 = vld [vmem:[%s479_s1 + $0x8] ss:$12 sps:$4 sm:$0xff]   ;;  %v340_v4 = vld [vmem:[%s479_s1] ss:$12 sps:$4 sm:$0xff]  }
   0x2   :  { %225 = vmatprep.mubr.bf16.mxu0 %v371_v3  ;;  %193 = vmatprep.subr.bf16.mxu0 %v337_v1  ;;  %v341_v5 = vld [vmem:[%s479_s1 + $0x1c] ss:$12 sps:$4 sm:$0xff]   ;;  %v343_v6 = vld [vmem:[%s479_s1 + $0x20] ss:$12 sps:$4 sm:$0xff]   ;;  %v344_v7 = vld [vmem:[%s479_s1 + $0x18] ss:$12 sps:$4 sm:$0xff]  }
   0x3   :  { %315 = vmatpush3.bf16.msra.mxu1 %v339_v2  ;;  %194 = vmatpush1.bf16.msra.mxu0 %v340_v4  ;;  %v345_v8 = vld [vmem:[%s479_s1 + $0x34] ss:$12 sps:$4 sm:$0xff]   ;;  %v347_v9 = vld [vmem:[%s479_s1 + $0x38] ss:$12 sps:$4 sm:$0xff]   ;;  %v348_v10 = vld [vmem:[%s479_s1 + $0x30] ss:$12 sps:$4 sm:$0xff]  }
   0x4   :  { %316 = vmatprep.subr.bf16.mxu1 %v369_v0  ;;  %195 = vmatprep.subr.bf16.mxu0 %v341_v5  ;;  %v349_v11 = vld [vmem:[%s479_s1 + $0x4c] ss:$12 sps:$4 sm:$0xff]   ;;  %v351_v12 = vld [vmem:[%s479_s1 + $0x50] ss:$12 sps:$4 sm:$0xff]   ;;  %v352_v13 = vld [vmem:[%s479_s1 + $0x48] ss:$12 sps:$4 sm:$0xff]  }
   0x5   :  { %v353_v14 = vld [vmem:[%s479_s1 + $0x64] ss:$12 sps:$4 sm:$0xff]   ;;  %v355_v15 = vld [vmem:[%s479_s1 + $0x68] ss:$12 sps:$4 sm:$0xff]   ;;  %v356_v16 = vld [vmem:[%s479_s1 + $0x60] ss:$12 sps:$4 sm:$0xff]  }
   0x6   :  { %v357_v17 = vld [vmem:[%s479_s1 + $0x7c] ss:$12 sps:$4 sm:$0xff]   ;;  %v359_v18 = vld [vmem:[%s479_s1 + $0x80] ss:$12 sps:$4 sm:$0xff]   ;;  %v360_v19 = vld [vmem:[%s479_s1 + $0x78] ss:$12 sps:$4 sm:$0xff]  }
   0x7   :  { %317 = vmatpush3.bf16.msra.mxu1 %v343_v6  ;;  %196 = vmatpush1.bf16.msra.mxu0 %v344_v7  ;;  %v361_v20 = vld [vmem:[%s479_s1 + $0x94] ss:$12 sps:$4 sm:$0xff]   ;;  %v363_v21 = vld [vmem:[%s479_s1 + $0x98] ss:$12 sps:$4 sm:$0xff]   ;;  %v364_v22 = vld [vmem:[%s479_s1 + $0x90] ss:$12 sps:$4 sm:$0xff]  }
   0x8   :  { %318 = vmatprep.subr.bf16.mxu1 %v369_v0  ;;  %197 = vmatprep.subr.bf16.mxu0 %v345_v8  ;;  %v365_v23 = vld [vmem:[%s479_s1 + $0xac] ss:$12 sps:$4 sm:$0xff]   ;;  %v367_v24 = vld [vmem:[%s479_s1 + $0xb0] ss:$12 sps:$4 sm:$0xff]   ;;  %v368_v25 = vld [vmem:[%s479_s1 + $0xa8] ss:$12 sps:$4 sm:$0xff]  }
   0x9   :  { %v15_v26 = vld [vmem:[%s480_s0] sm:$0xf]  ;;  %v51_v28 = vshrl.u32 %v50_v27, 7 }
   0xa   :  { %v48_v30 = vld [vmem:[%s481_s2] sm:$0x7] }
   0xb   :  { %319 = vmatpush3.bf16.msra.mxu1 %v347_v9  ;;  %198 = vmatpush1.bf16.msra.mxu0 %v348_v10  ;;  %v60_v29 = vsub.s32 2, %v51_v28  ;;  %v52_v31 = vsub.s32 0, %v51_v28  ;;  %v56_v32 = vsub.s32 1, %v51_v28 }
   0xc   :  { %320 = vmatprep.subr.bf16.mxu1 %v369_v0  ;;  %199 = vmatprep.subr.bf16.mxu0 %v349_v11 }
   0xd   :  { %v61_v33 = vrot.slane %v48_v30, %v60_v29  ;;  %v53_v34 = vrot.slane %v48_v30, %v52_v31  ;;  %v57_v35 = vrot.slane %v48_v30, %v56_v32 }
   0xf   :  { %321 = vmatpush3.bf16.msra.mxu1 %v351_v12  ;;  %200 = vmatpush1.bf16.msra.mxu0 %v352_v13 }
  0x10   :  { %322 = vmatprep.subr.bf16.mxu1 %v369_v0  ;;  %201 = vmatprep.subr.bf16.mxu0 %v353_v14 }
  0x13   :  { %323 = vmatpush3.bf16.msra.mxu1 %v355_v15  ;;  %202 = vmatpush1.bf16.msra.mxu0 %v356_v16 }
  0x14   :  { %324 = vmatprep.subr.bf16.mxu1 %v369_v0  ;;  %203 = vmatprep.subr.bf16.mxu0 %v357_v17 }
  0x17   :  { %325 = vmatpush3.bf16.msra.mxu1 %v359_v18  ;;  %204 = vmatpush1.bf16.msra.mxu0 %v360_v19 }
  0x18   :  { %326 = vmatprep.subr.bf16.mxu1 %v369_v0  ;;  %205 = vmatprep.subr.bf16.mxu0 %v361_v20 }
  0x1b   :  { %327 = vmatpush3.bf16.msra.mxu1 %v363_v21  ;;  %206 = vmatpush1.bf16.msra.mxu0 %v364_v22 }
  0x1c   :  { %328 = vmatprep.subr.bf16.mxu1 %v369_v0  ;;  %207 = vmatprep.subr.bf16.mxu0 %v365_v23 }
  0x1f   :  { %329 = vmatpush3.bf16.msra.mxu1 %v367_v24  ;;  %208 = vmatpush1.bf16.msra.mxu0 %v368_v25 }
  0x22   :  { %331 = vmatmul.mubr.bf16.vlgmr.msra.gmra.mrb[0].mxu1 %v15_v26  ;;  %226 = vmatmul.mubr.bf16.vlgmr.msra.gmra.mrb[0].mxu0 %v15_v26 }
  0xf5   :  { %v268_v36 = vpop.f32.mrb[0].mxu1  ;;  %v227_v38 = vpop.f32.mrb[0].mxu0 }
  0xf6   :  { %v269_v37 = vadd.f32 %v268_v36, %v61_v33  ;;  %v332_v39 = vpop.f32.mrb[1].mxu1  ;;  %v228_v40 = vadd.f32 %v227_v38, %v53_v34  ;;  %v229_v41 = vpop.f32.mrb[1].mxu0 }
  0xf7   :  { %v271_v42 = vpop.f32.mrb[2].mxu1  ;;  %v230_v43 = vadd.f32 %v229_v41, %v57_v35  ;;  %v231_v44 = vpop.f32.mrb[2].mxu0 }
  0xf8   :  { %276 = vst [vmem:[%s482_s3 + $0x10] sm:$0xff] %v269_v37  ;;  %v333_v45 = vpop.f32.mrb[3].mxu1  ;;  %274 = vst [vmem:[%s482_s3] sm:$0xff] %v228_v40  ;;  %v232_v46 = vpop.f32.mrb[3].mxu0 }
  0xf9   :  { %275 = vst [vmem:[%s482_s3 + $0x8] sm:$0xff] %v230_v43 }

// kernel: seq2seq_decoder_forward.11
= control target key start
LH: loop header
LB: loop body
LE: loop exit
PB: predicated region body
PF: predicated region fallthrough
CT: control target
= control target key end

     0   :  { %s355_s1 = inlined_call_operand.vmem [shape: bf16[128,128], index: 1, kind: input, shape index: {}]   ;;  %s356_s0 = inlined_call_operand.vmem [shape: bf16[64,128], index: 0, kind: input, shape index: {}]   ;;  %s357_s2 = inlined_call_operand.vmem [shape: f32[1,128], index: 2, kind: input, shape index: {}]   ;;  %s358_s3 = inlined_call_operand.vmem [shape: f32[64,128], index: 3, kind: output, shape index: {}]  }
   0x1   :  { %v260_v0 = vld [vmem:[%s355_s1] sm:$0xff]   ;;  %v261_v1 = vld [vmem:[%s355_s1 + $0x8] sm:$0xff]   ;;  %v262_v2 = vld [vmem:[%s355_s1 + $0x10] sm:$0xff]  }
   0x2   :  { %220 = vmatprep.subr.bf16.mxu0 %v260_v0  ;;  %244 = vmatprep.subr.bf16.mxu1 %v260_v0  ;;  %v263_v3 = vld [vmem:[%s355_s1 + $0x18] sm:$0xff]   ;;  %v268_v4 = vld [vmem:[%s356_s0] sm:$0xff]   ;;  %v269_v5 = vld [vmem:[%s356_s0 + $0x10] sm:$0xff]  }
   0x3   :  { %221 = vmatpush3.bf16.msra.mxu0 %v260_v0  ;;  %252 = vmatpush3.bf16.msra.mxu1 %v260_v0  ;;  %v264_v6 = vld [vmem:[%s355_s1 + $0x20] sm:$0xff]   ;;  %v265_v7 = vld [vmem:[%s355_s1 + $0x28] sm:$0xff]   ;;  %v266_v8 = vld [vmem:[%s355_s1 + $0x30] sm:$0xff]  }
   0x4   :  { %222 = vmatprep.subr.bf16.mxu0 %v261_v1  ;;  %245 = vmatprep.subr.bf16.mxu1 %v261_v1  ;;  %v267_v9 = vld [vmem:[%s355_s1 + $0x38] sm:$0xff]   ;;  %v270_v10 = vld [vmem:[%s356_s0 + $0x8] sm:$0xff]   ;;  %v195_v12 = vld [vmem:[%s357_s2] ss:$0 sm:$0xff] }
   0x5   :  { %236 = vmatprep.mubr.bf16.mxu0 %v268_v4  ;;  %240 = vmatprep.mubr.bf16.mxu1 %v269_v5  ;;  %v271_v11 = vld [vmem:[%s356_s0 + $0x18] sm:$0xff]  }
   0x7   :  { %223 = vmatpush3.bf16.msra.mxu0 %v261_v1  ;;  %253 = vmatpush3.bf16.msra.mxu1 %v261_v1 }
   0x8   :  { %224 = vmatprep.subr.bf16.mxu0 %v262_v2  ;;  %246 = vmatprep.subr.bf16.mxu1 %v262_v2 }
   0xb   :  { %225 = vmatpush3.bf16.msra.mxu0 %v262_v2  ;;  %254 = vmatpush3.bf16.msra.mxu1 %v262_v2 }
   0xc   :  { %226 = vmatprep.subr.bf16.mxu0 %v263_v3  ;;  %247 = vmatprep.subr.bf16.mxu1 %v263_v3 }
   0xf   :  { %227 = vmatpush3.bf16.msra.mxu0 %v263_v3  ;;  %255 = vmatpush3.bf16.msra.mxu1 %v263_v3 }
  0x10   :  { %228 = vmatprep.subr.bf16.mxu0 %v264_v6  ;;  %248 = vmatprep.subr.bf16.mxu1 %v264_v6 }
  0x13   :  { %229 = vmatpush3.bf16.msra.mxu0 %v264_v6  ;;  %256 = vmatpush3.bf16.msra.mxu1 %v264_v6 }
  0x14   :  { %230 = vmatprep.subr.bf16.mxu0 %v265_v7  ;;  %249 = vmatprep.subr.bf16.mxu1 %v265_v7 }
  0x17   :  { %231 = vmatpush3.bf16.msra.mxu0 %v265_v7  ;;  %257 = vmatpush3.bf16.msra.mxu1 %v265_v7 }
  0x18   :  { %232 = vmatprep.subr.bf16.mxu0 %v266_v8  ;;  %250 = vmatprep.subr.bf16.mxu1 %v266_v8 }
  0x1b   :  { %233 = vmatpush3.bf16.msra.mxu0 %v266_v8  ;;  %258 = vmatpush3.bf16.msra.mxu1 %v266_v8 }
  0x1c   :  { %234 = vmatprep.subr.bf16.mxu0 %v267_v9  ;;  %251 = vmatprep.subr.bf16.mxu1 %v267_v9 }
  0x1f   :  { %235 = vmatpush3.bf16.msra.mxu0 %v267_v9  ;;  %259 = vmatpush3.bf16.msra.mxu1 %v267_v9 }
  0x22   :  { %237 = vmatmul.mubr.bf16.vlgmr.msra.gmra.mrb[0].mxu0 %v270_v10  ;;  %241 = vmatmul.mubr.bf16.vlgmr.msra.gmra.mrb[0].mxu1 %v271_v11 }
  0xf5   :  { %v238_v13 = vpop.f32.mrb[0].mxu0  ;;  %v242_v14 = vpop.f32.mrb[0].mxu1 }
  0xf6   :  { %v161_v15 = vadd.f32 %v238_v13, %v195_v12  ;;  %v177_v16 = vadd.f32 %v242_v14, %v195_v12  ;;  %v152_v17 = vpop.f32.mrb[1].mxu0  ;;  %v168_v18 = vpop.f32.mrb[1].mxu1 }
  0xf7   :  { %v153_v19 = vadd.f32 %v195_v12, %v152_v17  ;;  %v169_v20 = vadd.f32 %v195_v12, %v168_v18  ;;  %v239_v21 = vpop.f32.mrb[2].mxu0  ;;  %v243_v22 = vpop.f32.mrb[2].mxu1 }
  0xf8   :  { %185 = vst [vmem:[%s358_s3 + $0x10] sm:$0xff] %v161_v15  ;;  %189 = vst [vmem:[%s358_s3 + $0x30] sm:$0xff] %v177_v16  ;;  %v164_v23 = vadd.f32 %v239_v21, %v195_v12  ;;  %v180_v24 = vadd.f32 %v243_v22, %v195_v12  ;;  %v155_v25 = vpop.f32.mrb[3].mxu0  ;;  %v171_v26 = vpop.f32.mrb[3].mxu1 }
  0xf9   :  { %183 = vst [vmem:[%s358_s3] sm:$0xff] %v153_v19  ;;  %187 = vst [vmem:[%s358_s3 + $0x20] sm:$0xff] %v169_v20  ;;  %v156_v27 = vadd.f32 %v195_v12, %v155_v25  ;;  %v172_v28 = vadd.f32 %v195_v12, %v171_v26 }
  0xfa   :  { %186 = vst [vmem:[%s358_s3 + $0x18] sm:$0xff] %v164_v23  ;;  %190 = vst [vmem:[%s358_s3 + $0x38] sm:$0xff] %v180_v24 }
  0xfb   :  { %184 = vst [vmem:[%s358_s3 + $0x8] sm:$0xff] %v156_v27  ;;  %188 = vst [vmem:[%s358_s3 + $0x28] sm:$0xff] %v172_v28 }

// kernel: seq2seq_decoder_forward.8
= control target key start
LH: loop header
LB: loop body
LE: loop exit
PB: predicated region body
PF: predicated region fallthrough
CT: control target
= control target key end

     0   :  { %v1551_v1 = vmov 0.0   ;;  %v1552_v2 = vmov 0   ;;  %vm1553_vm0 = vmmov 0   ;;  %s2193_s2 = inlined_call_operand.vmem [shape: bf16[128,384], index: 2, kind: input, shape index: {}]   ;;  %s2194_s4 = inlined_call_operand.vmem [shape: f32[8,128], index: 4, kind: input, shape index: {}]   ;;  %s2195_s0 = inlined_call_operand.vmem [shape: bf16[8,8,384], index: 0, kind: input, shape index: {}]   ;;  %s2196_s1 = inlined_call_operand.vmem [shape: f32[8,384], index: 1, kind: input, shape index: {}]   ;;  %s2197_s3 = inlined_call_operand.vmem [shape: f32[1,128], index: 3, kind: input, shape index: {}]   ;;  %s2198_s5 = inlined_call_operand.vmem [shape: bf16[8,8,128], index: 5, kind: output, shape index: {0}]   ;;  %s2199_s6 = inlined_call_operand.vmem [shape: f32[8,128], index: 6, kind: output, shape index: {1}]  }
   0x1   :  { %v1592_v0 = vld [vmem:[%s2193_s2 + $0x4] ss:$12 sps:$4 sm:$0xff]   ;;  %1258 = vmatprep.subr.bf16.mxu1 %v1551_v1  ;;  %235 = vmatprep.mubr.bf16.mxu0 %v1552_v2  ;;  %v1599_v3 = vld [vmem:[%s2193_s2] ss:$12 sps:$4 sm:$0xff]   ;;  %v1607_v4 = vld [vmem:[%s2193_s2 + $0x1c] ss:$12 sps:$4 sm:$0xff]  }
   0x2   :  { %1274 = vmatprep.mubr.msk.bf16.mxu1 %vm1553_vm0, %v1551_v1  ;;  %203 = vmatprep.subr.bf16.mxu0 %v1592_v0  ;;  %v1613_v5 = vld [vmem:[%s2193_s2 + $0x18] ss:$12 sps:$4 sm:$0xff]   ;;  %v1619_v6 = vld [vmem:[%s2193_s2 + $0x34] ss:$12 sps:$4 sm:$0xff]   ;;  %v1625_v7 = vld [vmem:[%s2193_s2 + $0x30] ss:$12 sps:$4 sm:$0xff]  }
   0x3   :  { %204 = vmatpush1.bf16.msra.mxu0 %v1599_v3  ;;  %v1631_v8 = vld [vmem:[%s2193_s2 + $0x4c] ss:$12 sps:$4 sm:$0xff]   ;;  %v1636_v9 = vld [vmem:[%s2193_s2 + $0x8] ss:$12 sps:$4 sm:$0xff]   ;;  %v1649_v11 = vld [vmem:[%s2193_s2 + $0x64] ss:$12 sps:$4 sm:$0xff]  }
   0x4   :  { %205 = vmatprep.subr.bf16.mxu0 %v1607_v4  ;;  %v1642_v10 = vld [vmem:[%s2193_s2 + $0x48] ss:$12 sps:$4 sm:$0xff]   ;;  %1259 = vmatpush3.bf16.msra.mxu1 %v1636_v9  ;;  %v1655_v12 = vld [vmem:[%s2193_s2 + $0x20] ss:$12 sps:$4 sm:$0xff]   ;;  %v1667_v14 = vld [vmem:[%s2193_s2 + $0x38] ss:$12 sps:$4 sm:$0xff]  }
   0x5   :  { %1260 = vmatprep.subr.bf16.mxu1 %v1551_v1  ;;  %v1660_v13 = vld [vmem:[%s2193_s2 + $0x60] ss:$12 sps:$4 sm:$0xff]   ;;  %v1673_v15 = vld [vmem:[%s2193_s2 + $0x7c] ss:$12 sps:$4 sm:$0xff]   ;;  %v1680_v16 = vld [vmem:[%s2193_s2 + $0x78] ss:$12 sps:$4 sm:$0xff]  }
   0x6   :  { %v1686_v17 = vld [vmem:[%s2193_s2 + $0x50] ss:$12 sps:$4 sm:$0xff]   ;;  %v1692_v18 = vld [vmem:[%s2193_s2 + $0x94] ss:$12 sps:$4 sm:$0xff]   ;;  %v1711_v21 = vld [vmem:[%s2193_s2 + $0xac] ss:$12 sps:$4 sm:$0xff]  }
   0x7   :  { %206 = vmatpush1.bf16.msra.mxu0 %v1613_v5  ;;  %v1699_v19 = vld [vmem:[%s2193_s2 + $0x90] ss:$12 sps:$4 sm:$0xff]   ;;  %v1705_v20 = vld [vmem:[%s2193_s2 + $0x68] ss:$12 sps:$4 sm:$0xff]   ;;  %v1723_v23 = vld [vmem:[%s2194_s4] sm:$0xff] }
   0x8   :  { %207 = vmatprep.subr.bf16.mxu0 %v1619_v6  ;;  %1261 = vmatpush3.bf16.msra.mxu1 %v1655_v12  ;;  %v1718_v22 = vld [vmem:[%s2193_s2 + $0xa8] ss:$12 sps:$4 sm:$0xff]   ;;  %v1729_v24 = vld [vmem:[%s2193_s2 + $0x80] ss:$12 sps:$4 sm:$0xff]   ;;  %v74_v25 = vpack.c.bf16 %v1723_v23, %v1723_v23  ;;  %v1740_v26 = vld [vmem:[%s2193_s2 + $0x98] ss:$12 sps:$4 sm:$0xff]  }
   0x9   :  { %1262 = vmatprep.subr.bf16.mxu1 %v1551_v1  ;;  %v1748_v27 = vld [vmem:[%s2193_s2 + $0xb0] ss:$12 sps:$4 sm:$0xff]   ;;  %v66_v28 = vld [vmem:[%s2195_s0] sm:$0xff]  ;;  %v1800_v36 = vld [vmem:[%s2196_s1 + $0x8] sm:$0xff] }
   0xa   :  { %v68_v29 = vunpack.c.l.bf16 %v66_v28  ;;  %v1794_v30 = vld [vmem:[%s2196_s1] sm:$0xff]  ;;  %v69_v34 = vunpack.c.h.bf16 %v66_v28  ;;  %v67_v49 = vld [vmem:[%s2195_s0 + $0x8] sm:$0xf]  ;;  %v1814_v52 = vld [vmem:[%s2196_s1 + $0x10] sm:$0xff] }
   0xb   :  { %208 = vmatpush1.bf16.msra.mxu0 %v1625_v7  ;;  %v1809_v50 = vld [vmem:[%s2197_s3] ss:$0 sm:$0xff]  ;;  %v70_v51 = vunpack.c.l.bf16 %v67_v49 }
   0xc   :  { %209 = vmatprep.subr.bf16.mxu0 %v1631_v8  ;;  %1263 = vmatpush3.bf16.msra.mxu1 %v1667_v14  ;;  %v71_v31 = vadd.f32 %v68_v29, %v1794_v30  ;;  %v72_v40 = vadd.f32 %v69_v34, %v1800_v36  ;;  %v1869_v49 = vld [vmem:[%s2195_s0 + $0x14] ss:$12 sps:$4 sm:$0xff]  }
   0xd   :  { %1264 = vmatprep.subr.bf16.mxu1 %v1551_v1  ;;  %v73_v55 = vadd.f32 %v70_v51, %v1814_v52  ;;  %v318_v51 = vunpack.c.l.bf16 %v1869_v49 }
   0xf   :  { %210 = vmatpush1.bf16.msra.mxu0 %v1642_v10 }
  0x10   :  { %211 = vmatprep.subr.bf16.mxu0 %v1649_v11  ;;  %1265 = vmatpush3.bf16.msra.mxu1 %v1686_v17 }
  0x11   :  { %1266 = vmatprep.subr.bf16.mxu1 %v1551_v1 }
  0x13   :  { %212 = vmatpush1.bf16.msra.mxu0 %v1660_v13 }
  0x14   :  { %213 = vmatprep.subr.bf16.mxu0 %v1673_v15  ;;  %1267 = vmatpush3.bf16.msra.mxu1 %v1705_v20 }
  0x15   :  { %1268 = vmatprep.subr.bf16.mxu1 %v1551_v1 }
  0x17   :  { %214 = vmatpush1.bf16.msra.mxu0 %v1680_v16 }
  0x18   :  { %215 = vmatprep.subr.bf16.mxu0 %v1692_v18  ;;  %1269 = vmatpush3.bf16.msra.mxu1 %v1729_v24 }
  0x19   :  { %1270 = vmatprep.subr.bf16.mxu1 %v1551_v1 }
  0x1b   :  { %216 = vmatpush1.bf16.msra.mxu0 %v1699_v19 }
  0x1c   :  { %217 = vmatprep.subr.bf16.mxu0 %v1711_v21  ;;  %1271 = vmatpush3.bf16.msra.mxu1 %v1740_v26 }
  0x1d   :  { %1272 = vmatprep.subr.bf16.mxu1 %v1551_v1 }
  0x1f   :  { %218 = vmatpush1.bf16.msra.mxu0 %v1718_v22 }
  0x20   :  { %322 = vmatprep.subr.bf16.mxu0 %v1592_v0  ;;  %1273 = vmatpush3.bf16.msra.mxu1 %v1748_v27 }
  0x21   :  { %1278 = vmatprep.subr.bf16.mxu1 %v1551_v1 }
  0x22   :  { %236 = vmatmul.mubr.bf16.vlgmr.msra.gmra.mrb[0].mxu0 %v74_v25 }
  0x23   :  { %323 = vmatpush1.bf16.msra.mxu0 %v1599_v3  ;;  %354 = vmatprep.mubr.bf16.mxu0 %v1552_v2 }
  0x24   :  { %324 = vmatprep.subr.bf16.mxu0 %v1607_v4  ;;  %1275 = vmatmul.mubr.bf16.vlgmr.msra.gmra.mrb[0].mxu1 %v74_v25 }
  0x25   :  { %1279 = vmatpush3.bf16.msra.mxu1 %v1636_v9  ;;  %1294 = vmatprep.mubr.msk.bf16.mxu1 %vm1553_vm0, %v1551_v1 }
  0x26   :  { %1280 = vmatprep.subr.bf16.mxu1 %v1551_v1 }
  0x27   :  { %325 = vmatpush1.bf16.msra.mxu0 %v1613_v5 }
  0x28   :  { %326 = vmatprep.subr.bf16.mxu0 %v1619_v6 }
  0x29   :  { %1281 = vmatpush3.bf16.msra.mxu1 %v1655_v12 }
  0x2a   :  { %1282 = vmatprep.subr.bf16.mxu1 %v1551_v1 }
  0x2b   :  { %327 = vmatpush1.bf16.msra.mxu0 %v1625_v7 }
  0x2c   :  { %328 = vmatprep.subr.bf16.mxu0 %v1631_v8 }
  0x2d   :  { %1283 = vmatpush3.bf16.msra.mxu1 %v1667_v14 }
  0x2e   :  { %1284 = vmatprep.subr.bf16.mxu1 %v1551_v1 }
  0x2f   :  { %329 = vmatpush1.bf16.msra.mxu0 %v1642_v10 }
  0x30   :  { %330 = vmatprep.subr.bf16.mxu0 %v1649_v11 }
  0x31   :  { %1285 = vmatpush3.bf16.msra.mxu1 %v1686_v17 }
  0x32   :  { %1286 = vmatprep.subr.bf16.mxu1 %v1551_v1 }
  0x33   :  { %331 = vmatpush1.bf16.msra.mxu0 %v1660_v13 }
  0x34   :  { %332 = vmatprep.subr.bf16.mxu0 %v1673_v15 }
  0x35   :  { %1287 = vmatpush3.bf16.msra.mxu1 %v1705_v20 }
  0x36   :  { %1288 = vmatprep.subr.bf16.mxu1 %v1551_v1 }
  0x37   :  { %333 = vmatpush1.bf16.msra.mxu0 %v1680_v16 }
  0x38   :  { %334 = vmatprep.subr.bf16.mxu0 %v1692_v18 }
  0x39   :  { %1289 = vmatpush3.bf16.msra.mxu1 %v1729_v24 }
  0x3a   :  { %1290 = vmatprep.subr.bf16.mxu1 %v1551_v1 }
  0x3b   :  { %335 = vmatpush1.bf16.msra.mxu0 %v1699_v19 }
  0x3c   :  { %336 = vmatprep.subr.bf16.mxu0 %v1711_v21 }
  0x3d   :  { %1291 = vmatpush3.bf16.msra.mxu1 %v1740_v26 }
  0x3e   :  { %1292 = vmatprep.subr.bf16.mxu1 %v1551_v1 }
  0x3f   :  { %337 = vmatpush1.bf16.msra.mxu0 %v1718_v22 }
  0x40   :  { %436 = vmatprep.subr.bf16.mxu0 %v1592_v0 }
  0x41   :  { %1293 = vmatpush3.bf16.msra.mxu1 %v1748_v27 }
  0x42   :  { %1298 = vmatprep.subr.bf16.mxu1 %v1551_v1 }
  0xf5   :  { %v237_v32 = vpop.f32.mrb[0].mxu0 }
  0xf6   :  { %v284_v33 = vadd.f32 %v237_v32, %v71_v31  ;;  %v239_v35 = vpop.f32.mrb[1].mxu0 }
  0xf7   :  { %v241_v37 = vpop.f32.mrb[2].mxu0  ;;  %v278_v41 = vpop.f32.mrb[0].mxu1  ;;  %v291_v42 = vadd.f32 %v239_v35, %v72_v40 }
  0xf8   :  { %v1148_v38 = vmul.f32 -1.442695, %v284_v33  ;;  %v242_v39 = vpop.f32.mrb[3].mxu0  ;;  %v1276_v43 = vpop.f32.mrb[1].mxu1  ;;  %v304_v53 = vadd.f32 %v1809_v50, %v278_v41 }
  0xf9   :  { %v281_v44 = vpop.f32.mrb[2].mxu1  ;;  %v1149_v46 = vmul.f32 -1.442695, %v291_v42 }
  0xfa   :  { %1453 = vpow2.f32 %v1148_v38  ;;  %v1277_v45 = vpop.f32.mrb[3].mxu1 }
  0xfb   :  { %1455 = vpow2.f32 %v1149_v46 }
 0x104   :  { %v1454_v47 = vpop.eup %1453 }
 0x105   :  { %v288_v48 = vadd.f32 1.0, %v1454_v47  ;;  %v1456_v54 = vpop.eup %1455 }
 0x106   :  { %v295_v58 = vadd.f32 1.0, %v1456_v54  ;;  %v321_v54 = vadd.f32 %v318_v51, %v1814_v52  ;;  %v432_v51 = vunpack.c.h.bf16 %v1869_v49 }
 0x107   :  { %1457 = vrcp.f32 %v288_v48 }
 0x111   :  { %v1458_v56 = vpop.eup %1457 }
 0x112   :  { %v305_v57 = vmul.f32 %v1458_v56, %v304_v53 }
 0x114   :  { %v306_v59 = vadd.f32 %v305_v57, %v73_v55 }
 0x116   :  { %1459 = vtanh.f32 %v306_v59 }
 0x117   :  { %1461 = vrcp.f32 %v295_v58 }
 0x120   :  { %v1460_v60 = vpop.eup %1459 }
 0x121   :  { %v308_v61 = vsub.f32 %v1723_v23, %v1460_v60  ;;  %v1462_v62 = vpop.eup %1461  ;;  %v1151_v23 = vld [vmem:[%s2195_s0 + $0xc] sm:$0xff] }
 0x122   :  { %v316_v29 = vunpack.c.l.bf16 %v1151_v23  ;;  %v317_v35 = vunpack.c.h.bf16 %v1151_v23 }
 0x123   :  { %v309_v63 = vmul.f32 %v1462_v62, %v308_v61 }
 0x124   :  { %v319_v31 = vadd.f32 %v316_v29, %v1794_v30  ;;  %v320_v44 = vadd.f32 %v317_v35, %v1800_v36 }
 0x125   :  { %v1819_v25 = vadd.f32 %v1460_v60, %v309_v63 }
 0x127   :  { %v311_v28 = vpack.c.bf16 %v1819_v25, %v1819_v25 }
 0x129   :  { %312 = vst [vmem:[%s2198_s5] sm:$0xf] %v311_v28  ;;  %355 = vmatmul.mubr.bf16.vlgmr.msra.gmra.mrb[4].mxu0 %v311_v28  ;;  %1295 = vmatmul.mubr.bf16.vlgmr.msra.gmra.mrb[4].mxu1 %v311_v28 }
 0x12a   :  { %437 = vmatpush1.bf16.msra.mxu0 %v1599_v3  ;;  %1299 = vmatpush3.bf16.msra.mxu1 %v1636_v9 }
 0x12b   :  { %438 = vmatprep.subr.bf16.mxu0 %v1607_v4  ;;  %1300 = vmatprep.subr.bf16.mxu1 %v1551_v1 }
 0x12c   :  { %468 = vmatprep.mubr.bf16.mxu0 %v1552_v2  ;;  %1314 = vmatprep.mubr.msk.bf16.mxu1 %vm1553_vm0, %v1551_v1 }
 0x12e   :  { %439 = vmatpush1.bf16.msra.mxu0 %v1613_v5  ;;  %1301 = vmatpush3.bf16.msra.mxu1 %v1655_v12 }
 0x12f   :  { %440 = vmatprep.subr.bf16.mxu0 %v1619_v6  ;;  %1302 = vmatprep.subr.bf16.mxu1 %v1551_v1 }
 0x132   :  { %441 = vmatpush1.bf16.msra.mxu0 %v1625_v7  ;;  %1303 = vmatpush3.bf16.msra.mxu1 %v1667_v14 }
 0x133   :  { %442 = vmatprep.subr.bf16.mxu0 %v1631_v8  ;;  %1304 = vmatprep.subr.bf16.mxu1 %v1551_v1 }
 0x136   :  { %443 = vmatpush1.bf16.msra.mxu0 %v1642_v10  ;;  %1305 = vmatpush3.bf16.msra.mxu1 %v1686_v17 }
 0x137   :  { %444 = vmatprep.subr.bf16.mxu0 %v1649_v11  ;;  %1306 = vmatprep.subr.bf16.mxu1 %v1551_v1 }
 0x13a   :  { %445 = vmatpush1.bf16.msra.mxu0 %v1660_v13  ;;  %1307 = vmatpush3.bf16.msra.mxu1 %v1705_v20 }
 0x13b   :  { %446 = vmatprep.subr.bf16.mxu0 %v1673_v15  ;;  %1308 = vmatprep.subr.bf16.mxu1 %v1551_v1 }
 0x13e   :  { %447 = vmatpush1.bf16.msra.mxu0 %v1680_v16  ;;  %1309 = vmatpush3.bf16.msra.mxu1 %v1729_v24 }
 0x13f   :  { %448 = vmatprep.subr.bf16.mxu0 %v1692_v18  ;;  %1310 = vmatprep.subr.bf16.mxu1 %v1551_v1 }
 0x142   :  { %449 = vmatpush1.bf16.msra.mxu0 %v1699_v19  ;;  %1311 = vmatpush3.bf16.msra.mxu1 %v1740_v26 }
 0x143   :  { %450 = vmatprep.subr.bf16.mxu0 %v1711_v21  ;;  %1312 = vmatprep.subr.bf16.mxu1 %v1551_v1 }
 0x146   :  { %451 = vmatpush1.bf16.msra.mxu0 %v1718_v22  ;;  %1313 = vmatpush3.bf16.msra.mxu1 %v1748_v27 }
 0x147   :  { %550 = vmatprep.subr.bf16.mxu0 %v1592_v0  ;;  %1318 = vmatprep.subr.bf16.mxu1 %v1551_v1 }
 0x1fc   :  { %v356_v32 = vpop.f32.mrb[4].mxu0  ;;  %v397_v33 = vpop.f32.mrb[4].mxu1 }
 0x1fd   :  { %v403_v34 = vadd.f32 %v356_v32, %v319_v31  ;;  %v358_v37 = vpop.f32.mrb[5].mxu0  ;;  %v1296_v38 = vpop.f32.mrb[5].mxu1  ;;  %v417_v55 = vadd.f32 %v1809_v50, %v397_v33 }
 0x1fe   :  { %v360_v39 = vpop.f32.mrb[6].mxu0  ;;  %v400_v40 = vpop.f32.mrb[6].mxu1  ;;  %v410_v45 = vadd.f32 %v358_v37, %v320_v44 }
 0x1ff   :  { %v1153_v41 = vmul.f32 -1.442695, %v403_v34  ;;  %v361_v42 = vpop.f32.mrb[7].mxu0  ;;  %v1297_v43 = vpop.f32.mrb[7].mxu1 }
 0x200   :  { %v1154_v46 = vmul.f32 -1.442695, %v410_v45 }
 0x201   :  { %1463 = vpow2.f32 %v1153_v41 }
 0x202   :  { %1465 = vpow2.f32 %v1154_v46 }
 0x20b   :  { %v1464_v47 = vpop.eup %1463 }
 0x20c   :  { %v407_v48 = vadd.f32 1.0, %v1464_v47  ;;  %v1466_v53 = vpop.eup %1465 }
 0x20d   :  { %v414_v59 = vadd.f32 1.0, %v1466_v53 }
 0x20e   :  { %1467 = vrcp.f32 %v407_v48 }
 0x218   :  { %v1468_v56 = vpop.eup %1467 }
 0x219   :  { %v418_v57 = vmul.f32 %v1468_v56, %v417_v55 }
 0x21b   :  { %v419_v58 = vadd.f32 %v418_v57, %v321_v54  ;;  %v435_v54 = vadd.f32 %v432_v51, %v1814_v52 }
 0x21d   :  { %1469 = vtanh.f32 %v419_v58 }
 0x21e   :  { %1471 = vrcp.f32 %v414_v59 }
 0x227   :  { %v1470_v60 = vpop.eup %1469 }
 0x228   :  { %v421_v61 = vsub.f32 %v1819_v25, %v1470_v60  ;;  %v1472_v62 = vpop.eup %1471  ;;  %v1156_v25 = vld [vmem:[%s2195_s0 + $0x18] sm:$0xff] }
 0x229   :  { %v430_v29 = vunpack.c.l.bf16 %v1156_v25  ;;  %v431_v35 = vunpack.c.h.bf16 %v1156_v25 }
 0x22a   :  { %v422_v63 = vmul.f32 %v1472_v62, %v421_v61 }
 0x22b   :  { %v433_v31 = vadd.f32 %v430_v29, %v1794_v30  ;;  %v434_v44 = vadd.f32 %v431_v35, %v1800_v36 }
 0x22c   :  { %v1875_v28 = vadd.f32 %v1470_v60, %v422_v63 }
 0x22e   :  { %v424_v23 = vpack.c.bf16 %v1875_v28, %v1875_v28 }
 0x230   :  { %1155 = vst [vmem:[%s2198_s5 + $0x4] sm:$0xf] %v424_v23  ;;  %469 = vmatmul.mubr.bf16.vlgmr.msra.gmra.mrb[8].mxu0 %v424_v23  ;;  %1315 = vmatmul.mubr.bf16.vlgmr.msra.gmra.mrb[8].mxu1 %v424_v23 }
 0x231   :  { %551 = vmatpush1.bf16.msra.mxu0 %v1599_v3  ;;  %1319 = vmatpush3.bf16.msra.mxu1 %v1636_v9 }
 0x232   :  { %552 = vmatprep.subr.bf16.mxu0 %v1607_v4  ;;  %1320 = vmatprep.subr.bf16.mxu1 %v1551_v1 }
 0x233   :  { %582 = vmatprep.mubr.bf16.mxu0 %v1552_v2  ;;  %1334 = vmatprep.mubr.msk.bf16.mxu1 %vm1553_vm0, %v1551_v1 }
 0x235   :  { %553 = vmatpush1.bf16.msra.mxu0 %v1613_v5  ;;  %1321 = vmatpush3.bf16.msra.mxu1 %v1655_v12 }
 0x236   :  { %554 = vmatprep.subr.bf16.mxu0 %v1619_v6  ;;  %1322 = vmatprep.subr.bf16.mxu1 %v1551_v1 }
 0x239   :  { %555 = vmatpush1.bf16.msra.mxu0 %v1625_v7  ;;  %1323 = vmatpush3.bf16.msra.mxu1 %v1667_v14 }
 0x23a   :  { %556 = vmatprep.subr.bf16.mxu0 %v1631_v8  ;;  %1324 = vmatprep.subr.bf16.mxu1 %v1551_v1 }
 0x23d   :  { %557 = vmatpush1.bf16.msra.mxu0 %v1642_v10  ;;  %1325 = vmatpush3.bf16.msra.mxu1 %v1686_v17 }
 0x23e   :  { %558 = vmatprep.subr.bf16.mxu0 %v1649_v11  ;;  %1326 = vmatprep.subr.bf16.mxu1 %v1551_v1 }
 0x241   :  { %559 = vmatpush1.bf16.msra.mxu0 %v1660_v13  ;;  %1327 = vmatpush3.bf16.msra.mxu1 %v1705_v20 }
 0x242   :  { %560 = vmatprep.subr.bf16.mxu0 %v1673_v15  ;;  %1328 = vmatprep.subr.bf16.mxu1 %v1551_v1 }
 0x245   :  { %561 = vmatpush1.bf16.msra.mxu0 %v1680_v16  ;;  %1329 = vmatpush3.bf16.msra.mxu1 %v1729_v24 }
 0x246   :  { %562 = vmatprep.subr.bf16.mxu0 %v1692_v18  ;;  %1330 = vmatprep.subr.bf16.mxu1 %v1551_v1 }
 0x249   :  { %563 = vmatpush1.bf16.msra.mxu0 %v1699_v19  ;;  %1331 = vmatpush3.bf16.msra.mxu1 %v1740_v26 }
 0x24a   :  { %564 = vmatprep.subr.bf16.mxu0 %v1711_v21  ;;  %1332 = vmatprep.subr.bf16.mxu1 %v1551_v1 }
 0x24d   :  { %565 = vmatpush1.bf16.msra.mxu0 %v1718_v22  ;;  %1333 = vmatpush3.bf16.msra.mxu1 %v1748_v27 }
 0x24e   :  { %664 = vmatprep.subr.bf16.mxu0 %v1592_v0  ;;  %1338 = vmatprep.subr.bf16.mxu1 %v1551_v1 }
 0x303   :  { %v470_v32 = vpop.f32.mrb[8].mxu0  ;;  %v511_v33 = vpop.f32.mrb[8].mxu1 }
 0x304   :  { %v517_v34 = vadd.f32 %v470_v32, %v433_v31  ;;  %v472_v37 = vpop.f32.mrb[9].mxu0  ;;  %v1316_v38 = vpop.f32.mrb[9].mxu1  ;;  %v531_v55 = vadd.f32 %v1809_v50, %v511_v33 }
 0x305   :  { %v474_v39 = vpop.f32.mrb[10].mxu0  ;;  %v514_v40 = vpop.f32.mrb[10].mxu1  ;;  %v524_v45 = vadd.f32 %v472_v37, %v434_v44 }
 0x306   :  { %v1158_v41 = vmul.f32 -1.442695, %v517_v34  ;;  %v475_v42 = vpop.f32.mrb[11].mxu0  ;;  %v1317_v43 = vpop.f32.mrb[11].mxu1 }
 0x307   :  { %v1159_v46 = vmul.f32 -1.442695, %v524_v45 }
 0x308   :  { %1473 = vpow2.f32 %v1158_v41 }
 0x309   :  { %1475 = vpow2.f32 %v1159_v46 }
 0x312   :  { %v1474_v47 = vpop.eup %1473 }
 0x313   :  { %v521_v48 = vadd.f32 1.0, %v1474_v47  ;;  %v1476_v53 = vpop.eup %1475 }
 0x314   :  { %v528_v59 = vadd.f32 1.0, %v1476_v53 }
 0x315   :  { %1477 = vrcp.f32 %v521_v48  ;;  %v1976_v48 = vld [vmem:[%s2195_s0 + $0x2c] ss:$12 sps:$4 sm:$0xff]  }
 0x316   :  { %v546_v51 = vunpack.c.l.bf16 %v1976_v48 }
 0x31f   :  { %v1478_v56 = vpop.eup %1477 }
 0x320   :  { %v532_v57 = vmul.f32 %v1478_v56, %v531_v55 }
 0x322   :  { %v533_v58 = vadd.f32 %v532_v57, %v435_v54  ;;  %v549_v54 = vadd.f32 %v546_v51, %v1814_v52 }
 0x324   :  { %1479 = vtanh.f32 %v533_v58 }
 0x325   :  { %1481 = vrcp.f32 %v528_v59 }
 0x32e   :  { %v1480_v60 = vpop.eup %1479 }
 0x32f   :  { %v535_v61 = vsub.f32 %v1875_v28, %v1480_v60  ;;  %v1482_v62 = vpop.eup %1481  ;;  %v1161_v28 = vld [vmem:[%s2195_s0 + $0x24] sm:$0xff] }
 0x330   :  { %v544_v25 = vunpack.c.l.bf16 %v1161_v28  ;;  %v545_v34 = vunpack.c.h.bf16 %v1161_v28 }
 0x331   :  { %v536_v63 = vmul.f32 %v1482_v62, %v535_v61 }
 0x332   :  { %v547_v29 = vadd.f32 %v544_v25, %v1794_v30  ;;  %v548_v43 = vadd.f32 %v545_v34, %v1800_v36 }
 0x333   :  { %v1926_v23 = vadd.f32 %v1480_v60, %v536_v63 }
 0x335   :  { %v538_v49 = vpack.c.bf16 %v1926_v23, %v1926_v23 }
 0x337   :  { %1160 = vst [vmem:[%s2198_s5 + $0x8] sm:$0xf] %v538_v49  ;;  %583 = vmatmul.mubr.bf16.vlgmr.msra.gmra.mrb[12].mxu0 %v538_v49  ;;  %1335 = vmatmul.mubr.bf16.vlgmr.msra.gmra.mrb[12].mxu1 %v538_v49 }
 0x338   :  { %665 = vmatpush1.bf16.msra.mxu0 %v1599_v3  ;;  %1339 = vmatpush3.bf16.msra.mxu1 %v1636_v9 }
 0x339   :  { %666 = vmatprep.subr.bf16.mxu0 %v1607_v4  ;;  %1340 = vmatprep.subr.bf16.mxu1 %v1551_v1 }
 0x33a   :  { %696 = vmatprep.mubr.bf16.mxu0 %v1552_v2  ;;  %1354 = vmatprep.mubr.msk.bf16.mxu1 %vm1553_vm0, %v1551_v1 }
 0x33c   :  { %667 = vmatpush1.bf16.msra.mxu0 %v1613_v5  ;;  %1341 = vmatpush3.bf16.msra.mxu1 %v1655_v12 }
 0x33d   :  { %668 = vmatprep.subr.bf16.mxu0 %v1619_v6  ;;  %1342 = vmatprep.subr.bf16.mxu1 %v1551_v1 }
 0x340   :  { %669 = vmatpush1.bf16.msra.mxu0 %v1625_v7  ;;  %1343 = vmatpush3.bf16.msra.mxu1 %v1667_v14 }
 0x341   :  { %670 = vmatprep.subr.bf16.mxu0 %v1631_v8  ;;  %1344 = vmatprep.subr.bf16.mxu1 %v1551_v1 }
 0x344   :  { %671 = vmatpush1.bf16.msra.mxu0 %v1642_v10  ;;  %1345 = vmatpush3.bf16.msra.mxu1 %v1686_v17 }
 0x345   :  { %672 = vmatprep.subr.bf16.mxu0 %v1649_v11  ;;  %1346 = vmatprep.subr.bf16.mxu1 %v1551_v1 }
 0x348   :  { %673 = vmatpush1.bf16.msra.mxu0 %v1660_v13  ;;  %1347 = vmatpush3.bf16.msra.mxu1 %v1705_v20 }
 0x349   :  { %674 = vmatprep.subr.bf16.mxu0 %v1673_v15  ;;  %1348 = vmatprep.subr.bf16.mxu1 %v1551_v1 }
 0x34c   :  { %675 = vmatpush1.bf16.msra.mxu0 %v1680_v16  ;;  %1349 = vmatpush3.bf16.msra.mxu1 %v1729_v24 }
 0x34d   :  { %676 = vmatprep.subr.bf16.mxu0 %v1692_v18  ;;  %1350 = vmatprep.subr.bf16.mxu1 %v1551_v1 }
 0x350   :  { %677 = vmatpush1.bf16.msra.mxu0 %v1699_v19  ;;  %1351 = vmatpush3.bf16.msra.mxu1 %v1740_v26 }
 0x351   :  { %678 = vmatprep.subr.bf16.mxu0 %v1711_v21  ;;  %1352 = vmatprep.subr.bf16.mxu1 %v1551_v1 }
 0x354   :  { %679 = vmatpush1.bf16.msra.mxu0 %v1718_v22  ;;  %1353 = vmatpush3.bf16.msra.mxu1 %v1748_v27 }
 0x355   :  { %778 = vmatprep.subr.bf16.mxu0 %v1592_v0  ;;  %1358 = vmatprep.subr.bf16.mxu1 %v1551_v1 }
 0x40a   :  { %v584_v31 = vpop.f32.mrb[12].mxu0  ;;  %v625_v32 = vpop.f32.mrb[12].mxu1 }
 0x40b   :  { %v631_v33 = vadd.f32 %v584_v31, %v547_v29  ;;  %v586_v35 = vpop.f32.mrb[13].mxu0  ;;  %v1336_v37 = vpop.f32.mrb[13].mxu1  ;;  %v645_v55 = vadd.f32 %v1809_v50, %v625_v32 }
 0x40c   :  { %v588_v38 = vpop.f32.mrb[14].mxu0  ;;  %v628_v39 = vpop.f32.mrb[14].mxu1  ;;  %v638_v44 = vadd.f32 %v586_v35, %v548_v43 }
 0x40d   :  { %v1163_v40 = vmul.f32 -1.442695, %v631_v33  ;;  %v589_v41 = vpop.f32.mrb[15].mxu0  ;;  %v1337_v42 = vpop.f32.mrb[15].mxu1 }
 0x40e   :  { %v1164_v45 = vmul.f32 -1.442695, %v638_v44 }
 0x40f   :  { %1483 = vpow2.f32 %v1163_v40 }
 0x410   :  { %1485 = vpow2.f32 %v1164_v45 }
 0x419   :  { %v1484_v46 = vpop.eup %1483 }
 0x41a   :  { %v635_v47 = vadd.f32 1.0, %v1484_v46  ;;  %v1486_v53 = vpop.eup %1485 }
 0x41b   :  { %v642_v59 = vadd.f32 1.0, %v1486_v53 }
 0x41c   :  { %1487 = vrcp.f32 %v635_v47  ;;  %v660_v47 = vunpack.c.h.bf16 %v1976_v48 }
 0x41e   :  { %v663_v53 = vadd.f32 %v660_v47, %v1814_v52  ;;  %v1537_v47 = vld [vmem:[%s2193_s2 + $0x18] ss:$12 sps:$4 sm:$0xff]  }
 0x426   :  { %v1488_v56 = vpop.eup %1487 }
 0x427   :  { %v646_v57 = vmul.f32 %v1488_v56, %v645_v55 }
 0x429   :  { %v647_v58 = vadd.f32 %v646_v57, %v549_v54 }
 0x42b   :  { %1489 = vtanh.f32 %v647_v58 }
 0x42c   :  { %1491 = vrcp.f32 %v642_v59 }
 0x435   :  { %v1490_v60 = vpop.eup %1489 }
 0x436   :  { %v649_v61 = vsub.f32 %v1926_v23, %v1490_v60  ;;  %v1492_v62 = vpop.eup %1491  ;;  %v1166_v23 = vld [vmem:[%s2195_s0 + $0x30] sm:$0xff] }
 0x437   :  { %v658_v25 = vunpack.c.l.bf16 %v1166_v23  ;;  %v659_v34 = vunpack.c.h.bf16 %v1166_v23 }
 0x438   :  { %v650_v63 = vmul.f32 %v1492_v62, %v649_v61 }
 0x439   :  { %v661_v29 = vadd.f32 %v658_v25, %v1794_v30  ;;  %v662_v42 = vadd.f32 %v659_v34, %v1800_v36  ;;  %v2085_v25 = vld [vmem:[%s2195_s0 + $0x44] ss:$12 sps:$4 sm:$0xff]  }
 0x43a   :  { %v1982_v49 = vadd.f32 %v1490_v60, %v650_v63 }
 0x43c   :  { %v652_v28 = vpack.c.bf16 %v1982_v49, %v1982_v49 }
 0x43e   :  { %1165 = vst [vmem:[%s2198_s5 + $0xc] sm:$0xf] %v652_v28  ;;  %697 = vmatmul.mubr.bf16.vlgmr.msra.gmra.mrb[16].mxu0 %v652_v28  ;;  %1355 = vmatmul.mubr.bf16.vlgmr.msra.gmra.mrb[16].mxu1 %v652_v28 }
 0x43f   :  { %779 = vmatpush1.bf16.msra.mxu0 %v1599_v3  ;;  %1359 = vmatpush3.bf16.msra.mxu1 %v1636_v9 }
 0x440   :  { %780 = vmatprep.subr.bf16.mxu0 %v1607_v4  ;;  %1360 = vmatprep.subr.bf16.mxu1 %v1551_v1 }
 0x441   :  { %810 = vmatprep.mubr.bf16.mxu0 %v1552_v2  ;;  %1374 = vmatprep.mubr.msk.bf16.mxu1 %vm1553_vm0, %v1551_v1 }
 0x443   :  { %781 = vmatpush1.bf16.msra.mxu0 %v1613_v5  ;;  %1361 = vmatpush3.bf16.msra.mxu1 %v1655_v12 }
 0x444   :  { %782 = vmatprep.subr.bf16.mxu0 %v1619_v6  ;;  %1362 = vmatprep.subr.bf16.mxu1 %v1551_v1 }
 0x447   :  { %783 = vmatpush1.bf16.msra.mxu0 %v1625_v7  ;;  %1363 = vmatpush3.bf16.msra.mxu1 %v1667_v14 }
 0x448   :  { %784 = vmatprep.subr.bf16.mxu0 %v1631_v8  ;;  %1364 = vmatprep.subr.bf16.mxu1 %v1551_v1 }
 0x44b   :  { %785 = vmatpush1.bf16.msra.mxu0 %v1642_v10  ;;  %1365 = vmatpush3.bf16.msra.mxu1 %v1686_v17 }
 0x44c   :  { %786 = vmatprep.subr.bf16.mxu0 %v1649_v11  ;;  %1366 = vmatprep.subr.bf16.mxu1 %v1551_v1 }
 0x44f   :  { %787 = vmatpush1.bf16.msra.mxu0 %v1660_v13  ;;  %1367 = vmatpush3.bf16.msra.mxu1 %v1705_v20 }
 0x450   :  { %788 = vmatprep.subr.bf16.mxu0 %v1673_v15  ;;  %1368 = vmatprep.subr.bf16.mxu1 %v1551_v1 }
 0x453   :  { %789 = vmatpush1.bf16.msra.mxu0 %v1680_v16  ;;  %1369 = vmatpush3.bf16.msra.mxu1 %v1729_v24 }
 0x454   :  { %790 = vmatprep.subr.bf16.mxu0 %v1692_v18  ;;  %1370 = vmatprep.subr.bf16.mxu1 %v1551_v1 }
 0x457   :  { %791 = vmatpush1.bf16.msra.mxu0 %v1699_v19  ;;  %1371 = vmatpush3.bf16.msra.mxu1 %v1740_v26 }
 0x458   :  { %792 = vmatprep.subr.bf16.mxu0 %v1711_v21  ;;  %1372 = vmatprep.subr.bf16.mxu1 %v1551_v1 }
 0x45b   :  { %793 = vmatpush1.bf16.msra.mxu0 %v1718_v22  ;;  %1373 = vmatpush3.bf16.msra.mxu1 %v1748_v27 }
 0x45c   :  { %892 = vmatprep.subr.bf16.mxu0 %v1592_v0  ;;  %1378 = vmatprep.subr.bf16.mxu1 %v1551_v1 }
 0x511   :  { %v698_v31 = vpop.f32.mrb[16].mxu0  ;;  %v739_v32 = vpop.f32.mrb[16].mxu1 }
 0x512   :  { %v745_v33 = vadd.f32 %v698_v31, %v661_v29  ;;  %v700_v35 = vpop.f32.mrb[17].mxu0  ;;  %v1356_v37 = vpop.f32.mrb[17].mxu1  ;;  %v759_v54 = vadd.f32 %v1809_v50, %v739_v32  ;;  %v774_v29 = vunpack.c.l.bf16 %v2085_v25 }
 0x513   :  { %v702_v38 = vpop.f32.mrb[18].mxu0  ;;  %v742_v39 = vpop.f32.mrb[18].mxu1  ;;  %v752_v43 = vadd.f32 %v700_v35, %v662_v42 }
 0x514   :  { %v1168_v40 = vmul.f32 -1.442695, %v745_v33  ;;  %v703_v41 = vpop.f32.mrb[19].mxu0  ;;  %v1357_v0 = vpop.f32.mrb[19].mxu1  ;;  %v777_v32 = vadd.f32 %v774_v29, %v1814_v52 }
 0x515   :  { %v1169_v44 = vmul.f32 -1.442695, %v752_v43 }
 0x516   :  { %1493 = vpow2.f32 %v1168_v40 }
 0x517   :  { %1495 = vpow2.f32 %v1169_v44  ;;  %v1534_v44 = vld [vmem:[%s2193_s2] ss:$12 sps:$4 sm:$0xff]  }
 0x520   :  { %v1494_v45 = vpop.eup %1493 }
 0x521   :  { %v749_v46 = vadd.f32 1.0, %v1494_v45  ;;  %v1496_v51 = vpop.eup %1495  ;;  %v1535_v45 = vld [vmem:[%s2193_s2 + $0x8] ss:$12 sps:$4 sm:$0xff]  }
 0x522   :  { %v756_v58 = vadd.f32 1.0, %v1496_v51  ;;  %v1538_v51 = vld [vmem:[%s2193_s2 + $0x20] ss:$12 sps:$4 sm:$0xff]  }
 0x523   :  { %1497 = vrcp.f32 %v749_v46  ;;  %v1536_v46 = vld [vmem:[%s2193_s2 + $0x1c] ss:$12 sps:$4 sm:$0xff]  }
 0x52d   :  { %v1498_v55 = vpop.eup %1497 }
 0x52e   :  { %v760_v56 = vmul.f32 %v1498_v55, %v759_v54  ;;  %v1541_v54 = vld [vmem:[%s2193_s2 + $0x38] ss:$12 sps:$4 sm:$0xff]  }
 0x52f   :  { %v1542_v55 = vld [vmem:[%s2193_s2 + $0x4c] ss:$12 sps:$4 sm:$0xff]  }
 0x530   :  { %v761_v57 = vadd.f32 %v760_v56, %v663_v53  ;;  %v1539_v53 = vld [vmem:[%s2193_s2 + $0x34] ss:$12 sps:$4 sm:$0xff]  }
 0x531   :  { %v1543_v56 = vld [vmem:[%s2193_s2 + $0x48] ss:$12 sps:$4 sm:$0xff]  }
 0x532   :  { %1499 = vtanh.f32 %v761_v57  ;;  %v1544_v57 = vld [vmem:[%s2193_s2 + $0x64] ss:$12 sps:$4 sm:$0xff]  }
 0x533   :  { %1501 = vrcp.f32 %v756_v58  ;;  %v1545_v58 = vld [vmem:[%s2193_s2 + $0x60] ss:$12 sps:$4 sm:$0xff]  }
 0x53c   :  { %v1500_v59 = vpop.eup %1499 }
 0x53d   :  { %v763_v60 = vsub.f32 %v1982_v49, %v1500_v59  ;;  %v1502_v61 = vpop.eup %1501 }
 0x53f   :  { %v764_v62 = vmul.f32 %v1502_v61, %v763_v60  ;;  %v1548_v60 = vld [vmem:[%s2193_s2 + $0x94] ss:$12 sps:$4 sm:$0xff]   ;;  %v1550_v61 = vld [vmem:[%s2193_s2 + $0xac] ss:$12 sps:$4 sm:$0xff]  }
 0x541   :  { %v2033_v63 = vadd.f32 %v1500_v59, %v764_v62  ;;  %v1546_v59 = vld [vmem:[%s2193_s2 + $0x7c] ss:$12 sps:$4 sm:$0xff]  }
 0x543   :  { %v766_v48 = vpack.c.bf16 %v2033_v63, %v2033_v63 }
 0x545   :  { %1170 = vst [vmem:[%s2198_s5 + $0x10] sm:$0xf] %v766_v48  ;;  %811 = vmatmul.mubr.bf16.vlgmr.msra.gmra.mrb[20].mxu0 %v766_v48  ;;  %1375 = vmatmul.mubr.bf16.vlgmr.msra.gmra.mrb[20].mxu1 %v766_v48 }
 0x546   :  { %893 = vmatpush1.bf16.msra.mxu0 %v1599_v3  ;;  %1379 = vmatpush3.bf16.msra.mxu1 %v1636_v9  ;;  %v1533_v3 = vld [vmem:[%s2193_s2 + $0x4] ss:$12 sps:$4 sm:$0xff]  }
 0x547   :  { %894 = vmatprep.subr.bf16.mxu0 %v1607_v4  ;;  %1380 = vmatprep.subr.bf16.mxu1 %v1551_v1  ;;  %v1171_v4 = vld [vmem:[%s2195_s0 + $0x3c] sm:$0xff] }
 0x548   :  { %924 = vmatprep.mubr.bf16.mxu0 %v1552_v2  ;;  %1394 = vmatprep.mubr.msk.bf16.mxu1 %vm1553_vm0, %v1551_v1 }
 0x54a   :  { %895 = vmatpush1.bf16.msra.mxu0 %v1613_v5  ;;  %1381 = vmatpush3.bf16.msra.mxu1 %v1655_v12  ;;  %v772_v5 = vunpack.c.l.bf16 %v1171_v4 }
 0x54b   :  { %896 = vmatprep.subr.bf16.mxu0 %v1619_v6  ;;  %1382 = vmatprep.subr.bf16.mxu1 %v1551_v1 }
 0x54c   :  { %v775_v6 = vadd.f32 %v772_v5, %v1794_v30 }
 0x54e   :  { %897 = vmatpush1.bf16.msra.mxu0 %v1625_v7  ;;  %1383 = vmatpush3.bf16.msra.mxu1 %v1667_v14 }
 0x54f   :  { %898 = vmatprep.subr.bf16.mxu0 %v1631_v8  ;;  %1384 = vmatprep.subr.bf16.mxu1 %v1551_v1 }
 0x552   :  { %899 = vmatpush1.bf16.msra.mxu0 %v1642_v10  ;;  %1385 = vmatpush3.bf16.msra.mxu1 %v1686_v17  ;;  %v773_v10 = vunpack.c.h.bf16 %v1171_v4 }
 0x553   :  { %900 = vmatprep.subr.bf16.mxu0 %v1649_v11  ;;  %1386 = vmatprep.subr.bf16.mxu1 %v1551_v1 }
 0x556   :  { %901 = vmatpush1.bf16.msra.mxu0 %v1660_v13  ;;  %1387 = vmatpush3.bf16.msra.mxu1 %v1705_v20 }
 0x557   :  { %902 = vmatprep.subr.bf16.mxu0 %v1673_v15  ;;  %1388 = vmatprep.subr.bf16.mxu1 %v1551_v1 }
 0x55a   :  { %903 = vmatpush1.bf16.msra.mxu0 %v1680_v16  ;;  %1389 = vmatpush3.bf16.msra.mxu1 %v1729_v24 }
 0x55b   :  { %904 = vmatprep.subr.bf16.mxu0 %v1692_v18  ;;  %1390 = vmatprep.subr.bf16.mxu1 %v1551_v1 }
 0x55e   :  { %905 = vmatpush1.bf16.msra.mxu0 %v1699_v19  ;;  %1391 = vmatpush3.bf16.msra.mxu1 %v1740_v26  ;;  %v776_v19 = vadd.f32 %v773_v10, %v1800_v36 }
 0x55f   :  { %906 = vmatprep.subr.bf16.mxu0 %v1711_v21  ;;  %1392 = vmatprep.subr.bf16.mxu1 %v1551_v1 }
 0x562   :  { %907 = vmatpush1.bf16.msra.mxu0 %v1718_v22  ;;  %1393 = vmatpush3.bf16.msra.mxu1 %v1748_v27 }
 0x563   :  { %1006 = vmatprep.subr.bf16.mxu0 %v1533_v3  ;;  %1398 = vmatprep.subr.bf16.mxu1 %v1551_v1 }
 0x618   :  { %v812_v7 = vpop.f32.mrb[20].mxu0  ;;  %v853_v8 = vpop.f32.mrb[20].mxu1 }
 0x619   :  { %v859_v9 = vadd.f32 %v812_v7, %v775_v6  ;;  %v814_v11 = vpop.f32.mrb[21].mxu0  ;;  %v1376_v12 = vpop.f32.mrb[21].mxu1  ;;  %v873_v33 = vadd.f32 %v1809_v50, %v853_v8 }
 0x61a   :  { %v816_v13 = vpop.f32.mrb[22].mxu0  ;;  %v856_v14 = vpop.f32.mrb[22].mxu1  ;;  %v866_v21 = vadd.f32 %v814_v11, %v776_v19 }
 0x61b   :  { %v1173_v15 = vmul.f32 -1.442695, %v859_v9  ;;  %v817_v16 = vpop.f32.mrb[23].mxu0  ;;  %v1377_v18 = vpop.f32.mrb[23].mxu1  ;;  %v888_v14 = vunpack.c.h.bf16 %v2085_v25  ;;  %v1181_v25 = vld [vmem:[%s2195_s0 + $0x54] sm:$0xff] }
 0x61c   :  { %v1174_v49 = vmul.f32 -1.442695, %v866_v21 }
 0x61d   :  { %1503 = vpow2.f32 %v1173_v15  ;;  %v891_v16 = vadd.f32 %v888_v14, %v1814_v52 }
 0x61e   :  { %1505 = vpow2.f32 %v1174_v49 }
 0x627   :  { %v1504_v28 = vpop.eup %1503 }
 0x628   :  { %v863_v23 = vadd.f32 1.0, %v1504_v28  ;;  %v1506_v31 = vpop.eup %1505 }
 0x629   :  { %v870_v38 = vadd.f32 1.0, %v1506_v31 }
 0x62a   :  { %1507 = vrcp.f32 %v863_v23 }
 0x634   :  { %v1508_v34 = vpop.eup %1507 }
 0x635   :  { %v874_v35 = vmul.f32 %v1508_v34, %v873_v33 }
 0x637   :  { %v875_v37 = vadd.f32 %v874_v35, %v777_v32  ;;  %v1000_v35 = vunpack.c.l.bf16 %v1181_v25 }
 0x639   :  { %1509 = vtanh.f32 %v875_v37  ;;  %v1003_v37 = vadd.f32 %v1000_v35, %v1794_v30 }
 0x63a   :  { %1511 = vrcp.f32 %v870_v38 }
 0x643   :  { %v1510_v39 = vpop.eup %1509 }
 0x644   :  { %v877_v40 = vsub.f32 %v2033_v63, %v1510_v39  ;;  %v1512_v41 = vpop.eup %1511 }
 0x646   :  { %v878_v0 = vmul.f32 %v1512_v41, %v877_v40  ;;  %v1001_v41 = vunpack.c.h.bf16 %v1181_v25 }
 0x648   :  { %v2091_v42 = vadd.f32 %v1510_v39, %v878_v0 }
 0x64a   :  { %v880_v43 = vpack.c.bf16 %v2091_v42, %v2091_v42 }
 0x64c   :  { %1175 = vst [vmem:[%s2198_s5 + $0x14] sm:$0xf] %v880_v43  ;;  %925 = vmatmul.mubr.bf16.vlgmr.msra.gmra.mrb[24].mxu0 %v880_v43  ;;  %1395 = vmatmul.mubr.bf16.vlgmr.msra.gmra.mrb[24].mxu1 %v880_v43 }
 0x64d   :  { %1007 = vmatpush1.bf16.msra.mxu0 %v1534_v44  ;;  %1399 = vmatpush3.bf16.msra.mxu1 %v1535_v45 }
 0x64e   :  { %1008 = vmatprep.subr.bf16.mxu0 %v1536_v46  ;;  %1400 = vmatprep.subr.bf16.mxu1 %v1551_v1 }
 0x64f   :  { %1038 = vmatprep.mubr.bf16.mxu0 %v1552_v2  ;;  %1414 = vmatprep.mubr.msk.bf16.mxu1 %vm1553_vm0, %v1551_v1  ;;  %v1540_v2 = vld [vmem:[%s2193_s2 + $0x30] ss:$12 sps:$4 sm:$0xff]  }
 0x651   :  { %1009 = vmatpush1.bf16.msra.mxu0 %v1537_v47  ;;  %1401 = vmatpush3.bf16.msra.mxu1 %v1538_v51  ;;  %v1004_v51 = vadd.f32 %v1001_v41, %v1800_v36 }
 0x652   :  { %1010 = vmatprep.subr.bf16.mxu0 %v1539_v53  ;;  %1402 = vmatprep.subr.bf16.mxu1 %v1551_v1 }
 0x655   :  { %1011 = vmatpush1.bf16.msra.mxu0 %v1540_v2  ;;  %1403 = vmatpush3.bf16.msra.mxu1 %v1541_v54 }
 0x656   :  { %1012 = vmatprep.subr.bf16.mxu0 %v1542_v55  ;;  %1404 = vmatprep.subr.bf16.mxu1 %v1551_v1 }
 0x659   :  { %1013 = vmatpush1.bf16.msra.mxu0 %v1543_v56  ;;  %1405 = vmatpush3.bf16.msra.mxu1 %v1686_v17  ;;  %v1547_v17 = vld [vmem:[%s2193_s2 + $0x78] ss:$12 sps:$4 sm:$0xff]  }
 0x65a   :  { %1014 = vmatprep.subr.bf16.mxu0 %v1544_v57  ;;  %1406 = vmatprep.subr.bf16.mxu1 %v1551_v1 }
 0x65d   :  { %1015 = vmatpush1.bf16.msra.mxu0 %v1545_v58  ;;  %1407 = vmatpush3.bf16.msra.mxu1 %v1705_v20  ;;  %v1549_v20 = vld [vmem:[%s2193_s2 + $0x90] ss:$12 sps:$4 sm:$0xff]  }
 0x65e   :  { %1016 = vmatprep.subr.bf16.mxu0 %v1546_v59  ;;  %1408 = vmatprep.subr.bf16.mxu1 %v1551_v1 }
 0x661   :  { %1017 = vmatpush1.bf16.msra.mxu0 %v1547_v17  ;;  %1409 = vmatpush3.bf16.msra.mxu1 %v1729_v24  ;;  %v1176_v24 = vld [vmem:[%s2195_s0 + $0x48] sm:$0xff] }
 0x662   :  { %1018 = vmatprep.subr.bf16.mxu0 %v1548_v60  ;;  %1410 = vmatprep.subr.bf16.mxu1 %v1551_v1  ;;  %v886_v62 = vunpack.c.l.bf16 %v1176_v24  ;;  %v887_v4 = vunpack.c.h.bf16 %v1176_v24 }
 0x664   :  { %v889_v63 = vadd.f32 %v886_v62, %v1794_v30  ;;  %v1182_v30 = vld [vmem:[%s2195_s0 + $0x5c] sm:$0xf] }
 0x665   :  { %1019 = vmatpush1.bf16.msra.mxu0 %v1549_v20  ;;  %1411 = vmatpush3.bf16.msra.mxu1 %v1740_v26  ;;  %v1002_v56 = vunpack.c.l.bf16 %v1182_v30 }
 0x666   :  { %1020 = vmatprep.subr.bf16.mxu0 %v1550_v61  ;;  %1412 = vmatprep.subr.bf16.mxu1 %v1551_v1 }
 0x667   :  { %v1005_v58 = vadd.f32 %v1002_v56, %v1814_v52 }
 0x669   :  { %1021 = vmatpush1.bf16.msra.mxu0 %v1718_v22  ;;  %1413 = vmatpush3.bf16.msra.mxu1 %v1748_v27  ;;  %v890_v27 = vadd.f32 %v887_v4, %v1800_v36 }
 0x71f   :  { %v926_v48 = vpop.f32.mrb[24].mxu0  ;;  %v967_v26 = vpop.f32.mrb[24].mxu1 }
 0x720   :  { %v973_v3 = vadd.f32 %v926_v48, %v889_v63  ;;  %v928_v5 = vpop.f32.mrb[25].mxu0  ;;  %v1396_v6 = vpop.f32.mrb[25].mxu1  ;;  %v987_v18 = vadd.f32 %v1809_v50, %v967_v26 }
 0x721   :  { %v930_v7 = vpop.f32.mrb[26].mxu0  ;;  %v970_v8 = vpop.f32.mrb[26].mxu1  ;;  %v980_v10 = vadd.f32 %v928_v5, %v890_v27 }
 0x722   :  { %v1178_v1 = vmul.f32 -1.442695, %v973_v3  ;;  %v931_v9 = vpop.f32.mrb[27].mxu0  ;;  %v1397_v22 = vpop.f32.mrb[27].mxu1 }
 0x723   :  { %v1179_v11 = vmul.f32 -1.442695, %v980_v10 }
 0x724   :  { %1513 = vpow2.f32 %v1178_v1 }
 0x725   :  { %1515 = vpow2.f32 %v1179_v11 }
 0x72e   :  { %v1514_v12 = vpop.eup %1513 }
 0x72f   :  { %v977_v13 = vadd.f32 1.0, %v1514_v12  ;;  %v1516_v15 = vpop.eup %1515 }
 0x730   :  { %v984_v28 = vadd.f32 1.0, %v1516_v15 }
 0x731   :  { %1517 = vrcp.f32 %v977_v13 }
 0x73b   :  { %v1518_v19 = vpop.eup %1517 }
 0x73c   :  { %v988_v21 = vmul.f32 %v1518_v19, %v987_v18 }
 0x73e   :  { %v989_v49 = vadd.f32 %v988_v21, %v891_v16 }
 0x740   :  { %1519 = vtanh.f32 %v989_v49 }
 0x741   :  { %1521 = vrcp.f32 %v984_v28 }
 0x74a   :  { %v1520_v23 = vpop.eup %1519 }
 0x74b   :  { %v991_v29 = vsub.f32 %v2091_v42, %v1520_v23  ;;  %v1522_v31 = vpop.eup %1521 }
 0x74d   :  { %v992_v32 = vmul.f32 %v1522_v31, %v991_v29 }
 0x74f   :  { %v993_v33 = vadd.f32 %v1520_v23, %v992_v32 }
 0x751   :  { %v994_v34 = vpack.c.bf16 %v993_v33, %v993_v33 }
 0x753   :  { %1180 = vst [vmem:[%s2198_s5 + $0x18] sm:$0xf] %v994_v34  ;;  %1039 = vmatmul.mubr.bf16.vlgmr.msra.gmra.mrb[28].mxu0 %v994_v34  ;;  %1415 = vmatmul.mubr.bf16.vlgmr.msra.gmra.mrb[28].mxu1 %v994_v34 }
 0x826   :  { %v1040_v38 = vpop.f32.mrb[28].mxu0  ;;  %v1081_v39 = vpop.f32.mrb[28].mxu1 }
 0x827   :  { %v1087_v40 = vadd.f32 %v1040_v38, %v1003_v37  ;;  %v1042_v0 = vpop.f32.mrb[29].mxu0  ;;  %v1416_v42 = vpop.f32.mrb[29].mxu1  ;;  %v1101_v59 = vadd.f32 %v1809_v50, %v1081_v39 }
 0x828   :  { %v1044_v43 = vpop.f32.mrb[30].mxu0  ;;  %v1084_v44 = vpop.f32.mrb[30].mxu1  ;;  %v1094_v53 = vadd.f32 %v1042_v0, %v1004_v51 }
 0x829   :  { %v1183_v45 = vmul.f32 -1.442695, %v1087_v40  ;;  %v1045_v46 = vpop.f32.mrb[31].mxu0  ;;  %v1417_v47 = vpop.f32.mrb[31].mxu1 }
 0x82a   :  { %v1184_v2 = vmul.f32 -1.442695, %v1094_v53 }
 0x82b   :  { %1523 = vpow2.f32 %v1183_v45 }
 0x82c   :  { %1525 = vpow2.f32 %v1184_v2 }
 0x835   :  { %v1524_v54 = vpop.eup %1523 }
 0x836   :  { %v1091_v55 = vadd.f32 1.0, %v1524_v54  ;;  %v1526_v57 = vpop.eup %1525 }
 0x837   :  { %v1098_v36 = vadd.f32 1.0, %v1526_v57 }
 0x838   :  { %1527 = vrcp.f32 %v1091_v55 }
 0x842   :  { %v1528_v17 = vpop.eup %1527 }
 0x843   :  { %v1102_v60 = vmul.f32 %v1528_v17, %v1101_v59 }
 0x845   :  { %v1103_v20 = vadd.f32 %v1102_v60, %v1005_v58 }
 0x847   :  { %1529 = vtanh.f32 %v1103_v20 }
 0x848   :  { %1531 = vrcp.f32 %v1098_v36 }
 0x851   :  { %v1530_v61 = vpop.eup %1529 }
 0x852   :  { %v1105_v24 = vsub.f32 %v993_v33, %v1530_v61  ;;  %v1532_v62 = vpop.eup %1531 }
 0x854   :  { %v1106_v63 = vmul.f32 %v1532_v62, %v1105_v24 }
 0x856   :  { %v1107_v48 = vadd.f32 %v1530_v61, %v1106_v63 }
 0x858   :  { %v1108_v26 = vpack.c.bf16 %v1107_v48, %v1107_v48  ;;  %1115 = vst [vmem:[%s2199_s6] sm:$0xff] %v1107_v48 }
 0x85a   :  { %1185 = vst [vmem:[%s2198_s5 + $0x1c] sm:$0xf] %v1108_v26 }

</bundles_post_ra>
